<compile_context>
chip_gen: v5e
topology: v5e:2x2
jax: 0.10.0
libtpu: 0.0.40
codegen_flags: <defaults>
</compile_context>

<pallas_src>
import jax
import jax.numpy as jnp
from jax.experimental import pallas as pl
from jax.experimental.pallas import tpu as pltpu

LANE = 128


def _round_up(n, m):
    return ((n + m - 1) // m) * m


def _pad_to(arr, shape):
    pads = [(0, s - d) for d, s in zip(arr.shape, shape)]
    return jnp.pad(arr, pads)


def _autoencoder_kernel(x_ref,
                        w1_ref, b1_ref, w2_ref, b2_ref, w3_ref, b3_ref,
                        w4_ref, b4_ref, w5_ref, b5_ref, w6_ref, b6_ref,
                        recon_ref, latent_ref):
    """Full autoencoder forward for one batch tile.

    x / weights are bf16 (MXU inputs); dots accumulate in f32; bias add and
    ReLU stay f32; activations are cast back to bf16 only at the next MXU op.
    """
    x = x_ref[...]                                     # (tile, 128) bf16

    def dense(a_bf16, w_ref, b_ref):
        # MXU matmul, f32 accumulation, f32 bias add (bias broadcast (1,N)).
        return jnp.dot(a_bf16, w_ref[...],
                       preferred_element_type=jnp.float32) + b_ref[...]

    bf16 = jnp.bfloat16

    # ---- encoder ----
    h = jnp.maximum(dense(x, w1_ref, b1_ref), 0.0)                 # ReLU (f32)
    h = jnp.maximum(dense(h.astype(bf16), w2_ref, b2_ref), 0.0)    # ReLU (f32)
    z = dense(h.astype(bf16), w3_ref, b3_ref)                      # latent (f32)

    # ---- decoder ----
    d = jnp.maximum(dense(z.astype(bf16), w4_ref, b4_ref), 0.0)
    d = jnp.maximum(dense(d.astype(bf16), w5_ref, b5_ref), 0.0)
    y = dense(d.astype(bf16), w6_ref, b6_ref)                      # recon (f32)

    recon_ref[...] = y        # decoder output (y in PyTorch forward)
    latent_ref[...] = z       # encoder output (x in PyTorch forward)


def autoencoder_forward(x, params, *, batch_tile=256):
    """Runs the Pallas autoencoder kernel.

    Args:
      x: (batch, input_dim) float32
      params: dict of weights/biases, weights stored as (in, out), biases (1, out)
      batch_tile: rows per grid step (multiple of 8).
    Returns:
      (reconstruction, latent) matching PyTorch's `return (y, x)`.
    """
    batch, input_dim = x.shape
    latent_dim = params["w3"].shape[1]

    # Lane-padded feature dims.
    d_in_p = _round_up(input_dim, LANE)
    h1_p = _round_up(100, LANE)
    h2_p = _round_up(50, LANE)
    lat_p = _round_up(latent_dim, LANE)

    # Batch tiling (tile must be a multiple of 8 and divide the padded batch).
    tile = min(batch_tile, _round_up(batch, 8))
    b_p = _round_up(batch, tile)
    grid = (b_p // tile,)

    # Host-side padding + bf16 cast of MXU inputs (biases stay f32).
    x_p = _pad_to(x, (b_p, d_in_p)).astype(jnp.bfloat16)
    padded_dims = [
        (d_in_p, h1_p),   # Linear(input_dim, 100)
        (h1_p, h2_p),     # Linear(100, 50)
        (h2_p, lat_p),    # Linear(50, latent_dim)
        (lat_p, h2_p),    # Linear(latent_dim, 50)
        (h2_p, h1_p),     # Linear(50, 100)
        (h1_p, d_in_p),   # Linear(100, input_dim)
    ]
    operands = [x_p]
    for i, (ip, op) in enumerate(padded_dims, start=1):
        operands.append(_pad_to(params[f"w{i}"], (ip, op)).astype(jnp.bfloat16))
        operands.append(_pad_to(params[f"b{i}"], (1, op)).astype(jnp.float32))

    def full_block(shape):
        # Weights/biases: full block, constant block index -> VMEM-resident
        # across all grid steps.  No closure over loop variables.
        return pl.BlockSpec(shape, lambda i: (0, 0))

    in_specs = [pl.BlockSpec((tile, d_in_p), lambda i: (i, 0))]     # x tile
    in_specs += [full_block(op.shape) for op in operands[1:]]

    out_specs = (
        pl.BlockSpec((tile, d_in_p), lambda i: (i, 0)),             # recon tile
        pl.BlockSpec((tile, lat_p), lambda i: (i, 0)),              # latent tile
    )

    recon_p, latent_p = pl.pallas_call(
        _autoencoder_kernel,
        out_shape=(
            jax.ShapeDtypeStruct((b_p, d_in_p), jnp.float32),
            jax.ShapeDtypeStruct((b_p, lat_p), jnp.float32),
        ),
        grid=grid,
        in_specs=in_specs,
        out_specs=out_specs,
        compiler_params=pltpu.CompilerParams(
            dimension_semantics=("parallel",)),
    )(*operands)

    # Strip the lane/batch padding (padded output columns are exactly 0).
    return recon_p[:batch, :input_dim], latent_p[:batch, :latent_dim]


def init_params(key, input_dim, latent_dim):
    """Deterministic synthetic parameter init (shapes match the PyTorch module)."""
    dims = [
        (input_dim, 100),   # encoder Linear(input_dim, 100)
        (100, 50),          # encoder Linear(100, 50)
        (50, latent_dim),   # encoder Linear(50, latent_dim)
        (latent_dim, 50),   # decoder Linear(latent_dim, 50)
        (50, 100),          # decoder Linear(50, 100)
        (100, input_dim),   # decoder Linear(100, input_dim)
    ]
    params = {}
    for i, (fan_in, fan_out) in enumerate(dims, start=1):
        key, kw, kb = jax.random.split(key, 3)
        bound = 1.0 / jnp.sqrt(float(fan_in))
        # weight stored as (in, out) == PyTorch weight.T
        params[f"w{i}"] = jax.random.uniform(
            kw, (fan_in, fan_out), jnp.float32, minval=-bound, maxval=bound)
        params[f"b{i}"] = jax.random.uniform(
            kb, (1, fan_out), jnp.float32, minval=-bound, maxval=bound)
    return params


def reference_forward_f32(x, params):
    """Plain-JAX full-f32 reference (semantic check, loose tolerance)."""
    h = jnp.maximum(x @ params["w1"] + params["b1"], 0.0)
    h = jnp.maximum(h @ params["w2"] + params["b2"], 0.0)
    z = h @ params["w3"] + params["b3"]
    d = jnp.maximum(z @ params["w4"] + params["b4"], 0.0)
    d = jnp.maximum(d @ params["w5"] + params["b5"], 0.0)
    y = d @ params["w6"] + params["b6"]
    return y, z


def reference_forward_mixed(x, params):
    """Plain-JAX reference on the same bf16-in / f32-accumulate path as the kernel."""
    bf16 = jnp.bfloat16

    def lin(a, w, b):
        return jnp.dot(a.astype(bf16), w.astype(bf16),
                       preferred_element_type=jnp.float32) + b

    h = jnp.maximum(lin(x, params["w1"], params["b1"]), 0.0)
    h = jnp.maximum(lin(h, params["w2"], params["b2"]), 0.0)
    z = lin(h, params["w3"], params["b3"])
    d = jnp.maximum(lin(z, params["w4"], params["b4"]), 0.0)
    d = jnp.maximum(lin(d, params["w5"], params["b5"]), 0.0)
    y = lin(d, params["w6"], params["b6"])
    return y, z


if __name__ == "__main__":
    batch = 512          # fills real MXU rows and exercises the batch grid (2 tiles)
    input_dim = 32
    latent_dim = 8

    key = jax.random.PRNGKey(0)
    key, kx = jax.random.split(key)
    x = jax.random.normal(kx, (batch, input_dim), jnp.float32)
    params = init_params(key, input_dim, latent_dim)

    recon, latent = autoencoder_forward(x, params, batch_tile=256)
    recon = jax.block_until_ready(recon)
    latent = jax.block_until_ready(latent)

    assert recon.shape == (batch, input_dim)
    assert latent.shape == (batch, latent_dim)

    # Exact-path check: same bf16-input / f32-accumulate math as the kernel.
    ref_recon_m, ref_latent_m = reference_forward_mixed(x, params)
    assert jnp.allclose(recon, ref_recon_m, atol=2e-3, rtol=2e-3)
    assert jnp.allclose(latent, ref_latent_m, atol=2e-3, rtol=2e-3)

    # Semantic sanity check vs. full-f32 reference (bf16 rounding -> loose tol).
    ref_recon, ref_latent = reference_forward_f32(x, params)
    assert jnp.allclose(recon, ref_recon, atol=1e-1, rtol=1e-1)
    assert jnp.allclose(latent, ref_latent, atol=1e-1, rtol=1e-1)

    print("KERNEL_OK")
</pallas_src>

<mosaic_0001>
module attributes {stable_mosaic.version = 11 : i64} {
  func.func @_autoencoder_kernel(%arg0: i32, %arg1: memref<256x128xbf16, #tpu.memory_space<vmem>>, %arg2: memref<128x128xbf16, #tpu.memory_space<vmem>>, %arg3: memref<1x128xf32, #tpu.memory_space<vmem>>, %arg4: memref<128x128xbf16, #tpu.memory_space<vmem>>, %arg5: memref<1x128xf32, #tpu.memory_space<vmem>>, %arg6: memref<128x128xbf16, #tpu.memory_space<vmem>>, %arg7: memref<1x128xf32, #tpu.memory_space<vmem>>, %arg8: memref<128x128xbf16, #tpu.memory_space<vmem>>, %arg9: memref<1x128xf32, #tpu.memory_space<vmem>>, %arg10: memref<128x128xbf16, #tpu.memory_space<vmem>>, %arg11: memref<1x128xf32, #tpu.memory_space<vmem>>, %arg12: memref<128x128xbf16, #tpu.memory_space<vmem>>, %arg13: memref<1x128xf32, #tpu.memory_space<vmem>>, %arg14: memref<256x128xf32, #tpu.memory_space<vmem>>, %arg15: memref<256x128xf32, #tpu.memory_space<vmem>>) attributes {dimension_semantics = [#tpu.dimension_semantics<parallel>], iteration_bounds = array<i64: 2>, scalar_prefetch = 0 : i64, scratch_operands = 0 : i64, tpu.core_type = #tpu.core_type<tc>, window_params = [{transform_indices = @transform_0, window_bounds = array<i64: 256, 128>}, {pipeline_mode = #tpu.pipeline_mode<synchronous>, transform_indices = @transform_1, window_bounds = array<i64: 128, 128>}, {pipeline_mode = #tpu.pipeline_mode<synchronous>, transform_indices = @transform_2, window_bounds = array<i64: 1, 128>}, {pipeline_mode = #tpu.pipeline_mode<synchronous>, transform_indices = @transform_3, window_bounds = array<i64: 128, 128>}, {pipeline_mode = #tpu.pipeline_mode<synchronous>, transform_indices = @transform_4, window_bounds = array<i64: 1, 128>}, {pipeline_mode = #tpu.pipeline_mode<synchronous>, transform_indices = @transform_5, window_bounds = array<i64: 128, 128>}, {pipeline_mode = #tpu.pipeline_mode<synchronous>, transform_indices = @transform_6, window_bounds = array<i64: 1, 128>}, {pipeline_mode = #tpu.pipeline_mode<synchronous>, transform_indices = @transform_7, window_bounds = array<i64: 128, 128>}, {pipeline_mode = #tpu.pipeline_mode<synchronous>, transform_indices = @transform_8, window_bounds = array<i64: 1, 128>}, {pipeline_mode = #tpu.pipeline_mode<synchronous>, transform_indices = @transform_9, window_bounds = array<i64: 128, 128>}, {pipeline_mode = #tpu.pipeline_mode<synchronous>, transform_indices = @transform_10, window_bounds = array<i64: 1, 128>}, {pipeline_mode = #tpu.pipeline_mode<synchronous>, transform_indices = @transform_11, window_bounds = array<i64: 128, 128>}, {pipeline_mode = #tpu.pipeline_mode<synchronous>, transform_indices = @transform_12, window_bounds = array<i64: 1, 128>}, {transform_indices = @transform_13, window_bounds = array<i64: 256, 128>}, {transform_indices = @transform_14, window_bounds = array<i64: 256, 128>}]} {
    %c0 = arith.constant 0 : index
    %c0_0 = arith.constant 0 : index
    %0 = vector.load %arg1[%c0, %c0_0] : memref<256x128xbf16, #tpu.memory_space<vmem>>, vector<256x128xbf16>
    %c0_1 = arith.constant 0 : index
    %c0_2 = arith.constant 0 : index
    %1 = vector.load %arg2[%c0_1, %c0_2] : memref<128x128xbf16, #tpu.memory_space<vmem>>, vector<128x128xbf16>
    %cst = arith.constant dense<0.000000e+00> : vector<256x128xf32>
    %2 = tpu.matmul %0, %1, %cst {dimension_numbers = #tpu.dot_dimension_numbers<[1], [0], [0], [1], [0, 0, 1, 1], [], []>} : vector<256x128xbf16>, vector<128x128xbf16>, vector<256x128xf32> -> vector<256x128xf32>
    %c0_3 = arith.constant 0 : index
    %c0_4 = arith.constant 0 : index
    %3 = vector.load %arg3[%c0_3, %c0_4] : memref<1x128xf32, #tpu.memory_space<vmem>>, vector<1x128xf32>
    %4 = vector.broadcast %3 : vector<1x128xf32> to vector<256x128xf32>
    %5 = arith.addf %2, %4 : vector<256x128xf32>
    %cst_5 = arith.constant 0.000000e+00 : f32
    %6 = vector.broadcast %cst_5 : f32 to vector<256x128xf32>
    %7 = arith.maximumf %5, %6 : vector<256x128xf32>
    %8 = arith.truncf %7 : vector<256x128xf32> to vector<256x128xbf16>
    %c0_6 = arith.constant 0 : index
    %c0_7 = arith.constant 0 : index
    %9 = vector.load %arg4[%c0_6, %c0_7] : memref<128x128xbf16, #tpu.memory_space<vmem>>, vector<128x128xbf16>
    %cst_8 = arith.constant dense<0.000000e+00> : vector<256x128xf32>
    %10 = tpu.matmul %8, %9, %cst_8 {dimension_numbers = #tpu.dot_dimension_numbers<[1], [0], [0], [1], [0, 0, 1, 1], [], []>} : vector<256x128xbf16>, vector<128x128xbf16>, vector<256x128xf32> -> vector<256x128xf32>
    %c0_9 = arith.constant 0 : index
    %c0_10 = arith.constant 0 : index
    %11 = vector.load %arg5[%c0_9, %c0_10] : memref<1x128xf32, #tpu.memory_space<vmem>>, vector<1x128xf32>
    %12 = vector.broadcast %11 : vector<1x128xf32> to vector<256x128xf32>
    %13 = arith.addf %10, %12 : vector<256x128xf32>
    %cst_11 = arith.constant 0.000000e+00 : f32
    %14 = vector.broadcast %cst_11 : f32 to vector<256x128xf32>
    %15 = arith.maximumf %13, %14 : vector<256x128xf32>
    %16 = arith.truncf %15 : vector<256x128xf32> to vector<256x128xbf16>
    %c0_12 = arith.constant 0 : index
    %c0_13 = arith.constant 0 : index
    %17 = vector.load %arg6[%c0_12, %c0_13] : memref<128x128xbf16, #tpu.memory_space<vmem>>, vector<128x128xbf16>
    %cst_14 = arith.constant dense<0.000000e+00> : vector<256x128xf32>
    %18 = tpu.matmul %16, %17, %cst_14 {dimension_numbers = #tpu.dot_dimension_numbers<[1], [0], [0], [1], [0, 0, 1, 1], [], []>} : vector<256x128xbf16>, vector<128x128xbf16>, vector<256x128xf32> -> vector<256x128xf32>
    %c0_15 = arith.constant 0 : index
    %c0_16 = arith.constant 0 : index
    %19 = vector.load %arg7[%c0_15, %c0_16] : memref<1x128xf32, #tpu.memory_space<vmem>>, vector<1x128xf32>
    %20 = vector.broadcast %19 : vector<1x128xf32> to vector<256x128xf32>
    %21 = arith.addf %18, %20 : vector<256x128xf32>
    %22 = arith.truncf %21 : vector<256x128xf32> to vector<256x128xbf16>
    %c0_17 = arith.constant 0 : index
    %c0_18 = arith.constant 0 : index
    %23 = vector.load %arg8[%c0_17, %c0_18] : memref<128x128xbf16, #tpu.memory_space<vmem>>, vector<128x128xbf16>
    %cst_19 = arith.constant dense<0.000000e+00> : vector<256x128xf32>
    %24 = tpu.matmul %22, %23, %cst_19 {dimension_numbers = #tpu.dot_dimension_numbers<[1], [0], [0], [1], [0, 0, 1, 1], [], []>} : vector<256x128xbf16>, vector<128x128xbf16>, vector<256x128xf32> -> vector<256x128xf32>
    %c0_20 = arith.constant 0 : index
    %c0_21 = arith.constant 0 : index
    %25 = vector.load %arg9[%c0_20, %c0_21] : memref<1x128xf32, #tpu.memory_space<vmem>>, vector<1x128xf32>
    %26 = vector.broadcast %25 : vector<1x128xf32> to vector<256x128xf32>
    %27 = arith.addf %24, %26 : vector<256x128xf32>
    %cst_22 = arith.constant 0.000000e+00 : f32
    %28 = vector.broadcast %cst_22 : f32 to vector<256x128xf32>
    %29 = arith.maximumf %27, %28 : vector<256x128xf32>
    %30 = arith.truncf %29 : vector<256x128xf32> to vector<256x128xbf16>
    %c0_23 = arith.constant 0 : index
    %c0_24 = arith.constant 0 : index
    %31 = vector.load %arg10[%c0_23, %c0_24] : memref<128x128xbf16, #tpu.memory_space<vmem>>, vector<128x128xbf16>
    %cst_25 = arith.constant dense<0.000000e+00> : vector<256x128xf32>
    %32 = tpu.matmul %30, %31, %cst_25 {dimension_numbers = #tpu.dot_dimension_numbers<[1], [0], [0], [1], [0, 0, 1, 1], [], []>} : vector<256x128xbf16>, vector<128x128xbf16>, vector<256x128xf32> -> vector<256x128xf32>
    %c0_26 = arith.constant 0 : index
    %c0_27 = arith.constant 0 : index
    %33 = vector.load %arg11[%c0_26, %c0_27] : memref<1x128xf32, #tpu.memory_space<vmem>>, vector<1x128xf32>
    %34 = vector.broadcast %33 : vector<1x128xf32> to vector<256x128xf32>
    %35 = arith.addf %32, %34 : vector<256x128xf32>
    %cst_28 = arith.constant 0.000000e+00 : f32
    %36 = vector.broadcast %cst_28 : f32 to vector<256x128xf32>
    %37 = arith.maximumf %35, %36 : vector<256x128xf32>
    %38 = arith.truncf %37 : vector<256x128xf32> to vector<256x128xbf16>
    %c0_29 = arith.constant 0 : index
    %c0_30 = arith.constant 0 : index
    %39 = vector.load %arg12[%c0_29, %c0_30] : memref<128x128xbf16, #tpu.memory_space<vmem>>, vector<128x128xbf16>
    %cst_31 = arith.constant dense<0.000000e+00> : vector<256x128xf32>
    %40 = tpu.matmul %38, %39, %cst_31 {dimension_numbers = #tpu.dot_dimension_numbers<[1], [0], [0], [1], [0, 0, 1, 1], [], []>} : vector<256x128xbf16>, vector<128x128xbf16>, vector<256x128xf32> -> vector<256x128xf32>
    %c0_32 = arith.constant 0 : index
    %c0_33 = arith.constant 0 : index
    %41 = vector.load %arg13[%c0_32, %c0_33] : memref<1x128xf32, #tpu.memory_space<vmem>>, vector<1x128xf32>
    %42 = vector.broadcast %41 : vector<1x128xf32> to vector<256x128xf32>
    %43 = arith.addf %40, %42 : vector<256x128xf32>
    %c0_34 = arith.constant 0 : index
    %c0_35 = arith.constant 0 : index
    %44 = vector.load %arg14[%c0_34, %c0_35] : memref<256x128xf32, #tpu.memory_space<vmem>>, vector<256x128xf32>
    tpu.vector_store %arg14[%c0_34, %c0_35], %43 {strides = array<i32>} : memref<256x128xf32, #tpu.memory_space<vmem>>, vector<256x128xf32>,
    %c0_36 = arith.constant 0 : index
    %c0_37 = arith.constant 0 : index
    %45 = vector.load %arg15[%c0_36, %c0_37] : memref<256x128xf32, #tpu.memory_space<vmem>>, vector<256x128xf32>
    tpu.vector_store %arg15[%c0_36, %c0_37], %21 {strides = array<i32>} : memref<256x128xf32, #tpu.memory_space<vmem>>, vector<256x128xf32>,
    return
  }
  func.func @transform_0(%arg0: i32) -> (i32, i32) {
    %c0_i32 = arith.constant 0 : i32
    %c0_i32_0 = arith.constant 0 : i32
    return %arg0, %c0_i32 : i32, i32
  }
  func.func @transform_1(%arg0: i32) -> (i32, i32) {
    %c0_i32 = arith.constant 0 : i32
    %c0_i32_0 = arith.constant 0 : i32
    %c0_i32_1 = arith.constant 0 : i32
    return %c0_i32, %c0_i32_0 : i32, i32
  }
  func.func @transform_2(%arg0: i32) -> (i32, i32) {
    %c0_i32 = arith.constant 0 : i32
    %c0_i32_0 = arith.constant 0 : i32
    %c0_i32_1 = arith.constant 0 : i32
    return %c0_i32, %c0_i32_0 : i32, i32
  }
  func.func @transform_3(%arg0: i32) -> (i32, i32) {
    %c0_i32 = arith.constant 0 : i32
    %c0_i32_0 = arith.constant 0 : i32
    %c0_i32_1 = arith.constant 0 : i32
    return %c0_i32, %c0_i32_0 : i32, i32
  }
  func.func @transform_4(%arg0: i32) -> (i32, i32) {
    %c0_i32 = arith.constant 0 : i32
    %c0_i32_0 = arith.constant 0 : i32
    %c0_i32_1 = arith.constant 0 : i32
    return %c0_i32, %c0_i32_0 : i32, i32
  }
  func.func @transform_5(%arg0: i32) -> (i32, i32) {
    %c0_i32 = arith.constant 0 : i32
    %c0_i32_0 = arith.constant 0 : i32
    %c0_i32_1 = arith.constant 0 : i32
    return %c0_i32, %c0_i32_0 : i32, i32
  }
  func.func @transform_6(%arg0: i32) -> (i32, i32) {
    %c0_i32 = arith.constant 0 : i32
    %c0_i32_0 = arith.constant 0 : i32
    %c0_i32_1 = arith.constant 0 : i32
    return %c0_i32, %c0_i32_0 : i32, i32
  }
  func.func @transform_7(%arg0: i32) -> (i32, i32) {
    %c0_i32 = arith.constant 0 : i32
    %c0_i32_0 = arith.constant 0 : i32
    %c0_i32_1 = arith.constant 0 : i32
    return %c0_i32, %c0_i32_0 : i32, i32
  }
  func.func @transform_8(%arg0: i32) -> (i32, i32) {
    %c0_i32 = arith.constant 0 : i32
    %c0_i32_0 = arith.constant 0 : i32
    %c0_i32_1 = arith.constant 0 : i32
    return %c0_i32, %c0_i32_0 : i32, i32
  }
  func.func @transform_9(%arg0: i32) -> (i32, i32) {
    %c0_i32 = arith.constant 0 : i32
    %c0_i32_0 = arith.constant 0 : i32
    %c0_i32_1 = arith.constant 0 : i32
    return %c0_i32, %c0_i32_0 : i32, i32
  }
  func.func @transform_10(%arg0: i32) -> (i32, i32) {
    %c0_i32 = arith.constant 0 : i32
    %c0_i32_0 = arith.constant 0 : i32
    %c0_i32_1 = arith.constant 0 : i32
    return %c0_i32, %c0_i32_0 : i32, i32
  }
  func.func @transform_11(%arg0: i32) -> (i32, i32) {
    %c0_i32 = arith.constant 0 : i32
    %c0_i32_0 = arith.constant 0 : i32
    %c0_i32_1 = arith.constant 0 : i32
    return %c0_i32, %c0_i32_0 : i32, i32
  }
  func.func @transform_12(%arg0: i32) -> (i32, i32) {
    %c0_i32 = arith.constant 0 : i32
    %c0_i32_0 = arith.constant 0 : i32
    %c0_i32_1 = arith.constant 0 : i32
    return %c0_i32, %c0_i32_0 : i32, i32
  }
  func.func @transform_13(%arg0: i32) -> (i32, i32) {
    %c0_i32 = arith.constant 0 : i32
    %c0_i32_0 = arith.constant 0 : i32
    return %arg0, %c0_i32 : i32, i32
  }
  func.func @transform_14(%arg0: i32) -> (i32, i32) {
    %c0_i32 = arith.constant 0 : i32
    %c0_i32_0 = arith.constant 0 : i32
    return %arg0, %c0_i32 : i32, i32
  }
}

</mosaic_0001>

<bundles_post_ra>
// kernel: tpu_custom_call.1
= control target key start
LH: loop header
LB: loop body
LE: loop exit
PB: predicated region body
PF: predicated region fallthrough
CT: control target
= control target key end

     0   :  { %s3583_s0 = inlined_call_operand.hbm [shape: bf16[512,128], index: 0, kind: input, shape index: {}]   ;;  %s3584_s1 = inlined_call_operand.hbm [shape: bf16[128,128], index: 1, kind: input, shape index: {}]   ;;  %s3585_s2 = inlined_call_operand.vmem [shape: f32[1,128], index: 2, kind: input, shape index: {}]   ;;  %s3586_s3 = inlined_call_operand.hbm [shape: bf16[128,128], index: 3, kind: input, shape index: {}]   ;;  %s3587_s4 = inlined_call_operand.vmem [shape: f32[1,128], index: 4, kind: input, shape index: {}]   ;;  %s3588_s5 = inlined_call_operand.hbm [shape: bf16[128,128], index: 5, kind: input, shape index: {}]   ;;  %s3589_s6 = inlined_call_operand.vmem [shape: f32[1,128], index: 6, kind: input, shape index: {}]   ;;  %s3590_s7 = inlined_call_operand.hbm [shape: bf16[128,128], index: 7, kind: input, shape index: {}]   ;;  %s3591_s8 = inlined_call_operand.vmem [shape: f32[1,128], index: 8, kind: input, shape index: {}]   ;;  %s3592_s9 = inlined_call_operand.hbm [shape: bf16[128,128], index: 9, kind: input, shape index: {}]   ;;  %s3593_s10 = inlined_call_operand.vmem [shape: f32[1,128], index: 10, kind: input, shape index: {}]   ;;  %s3594_s11 = inlined_call_operand.hbm [shape: bf16[128,128], index: 11, kind: input, shape index: {}]   ;;  %s3595_s12 = inlined_call_operand.vmem [shape: f32[1,128], index: 12, kind: input, shape index: {}]   ;;  %s3596_s13 = inlined_call_operand.hbm [shape: f32[512,128], index: 13, kind: output, shape index: {0}]   ;;  %s3597_s14 = inlined_call_operand.hbm [shape: f32[512,128], index: 14, kind: output, shape index: {1}]  }
   0x1   :  { %3602 = sst [smem:[#allocation24_spill]] %s3583_s0 }
   0x2   :  { %3603 = sst [smem:[#allocation25_spill]] %s3584_s1 }
   0x3   :  { %3604 = sst [smem:[#allocation26_spill]] %s3586_s3 }
   0x4   :  { %3605 = sst [smem:[#allocation27_spill]] %s3588_s5 }
   0x5   :  { %3606 = sst [smem:[#allocation28_spill]] %s3590_s7 }
   0x6   :  { %3607 = sst [smem:[#allocation29_spill]] %s3592_s9 }
   0x7   :  { %3608 = sst [smem:[#allocation30_spill]] %s3594_s11 }
   0x8   :  { %3609 = sst [smem:[#allocation31_spill]] %s3596_s13 }
   0x9   :  { %3610 = sst [smem:[#allocation32_spill]] %s3597_s14 }
   0xa   :  { %20 = vsyncpa [#allocation3], 0 }
   0xb   :  { %22 = vsyncpa [#allocation3 + $0x1], 0 }
   0xc   :  { %23 = vsyncpa [#allocation6], 0 }
   0xd   :  { %24 = vsyncpa [#allocation9], 0 }
   0xe   :  { %25 = vsyncpa [#allocation12], 0 }
   0xf   :  { %26 = vsyncpa [#allocation4], 0 }
  0x10   :  { %28 = vsyncpa [#allocation4 + $0x1], 0 }
  0x11   :  { %29 = vsyncpa [#allocation16], 0 }
  0x12   :  { %31 = vsyncpa [#allocation16 + $0x1], 0  ;;  %s3042_s29 = smov 0   ;;  %s3044_s30 = smov 0  }
  0x13   :  { %s3046_s15 = smov 0   ;;  %s3048_s16 = smov 0  }
  0x14 LB: > { %s3611_s1 = sld [smem:[#allocation25_spill]]  ;;  %s3066_s20 = sadd.s32 4294967295, %s2955_s16   ;;  %s2955_s16 = sphi %s3048_s16, %s3635_s16   ;;  %s2951_s15 = sphi %s3046_s15, %s3634_s15   ;;  %s2947_s30 = sphi %s3044_s30, %s3633_s30   ;;  %s2943_s29 = sphi %s3042_s29, %s3632_s29  }
  0x15   : > { %p2145_p0 = scmp.ge.s32.totalorder %s2955_s16, 1  ;;  %p58_p1 = scmp.eq.s32.totalorder %s3066_s20, 0 }
  0x16   : > { %p372_p2 = scmp.lt.s32.totalorder %s2955_s16, 3  ;;  %s2957_s22 = smov [#allocation5]  }
  0x17   : > { %s385_s23 = sshll.u32 %s2957_s22, 4  ;;  %s3613_s5 = sld [smem:[#allocation27_spill]]  ;;  %s386_s23 = int_to_ptr.vmem [resolvable:$true] %s385_s23 }
  0x18   : > { %p3071_p3 = pnand %p2145_p0, %p372_p2  ;;  %s3615_s9 = sld [smem:[#allocation29_spill]] }
  0x19   : > { %s2958_s22 = smov [#allocation8]   ;;  %s3600_s13 = smov 64  }
  0x1a   : > { %s383_s19 = sshll.u32 %s3611_s1, 4  ;;  %p2543_p4 = pneg %p3071_p3  ;;  %s384_s19 = int_to_ptr.hbm [resolvable:$true] %s383_s19 }
  0x1b   : > { %s419_s1 = sshll.u32 %s2958_s22, 4  ;;  %s3601_s14 = smov 4   ;;  %s420_s1 = int_to_ptr.vmem [resolvable:$true] %s419_s1 }
  0x1c   : > { %p3083_p6 = pnand %p2543_p4, %p58_p1  ;;  %s3616_s3 = sld [smem:[#allocation26_spill]] }
  0x1d   : > { %s417_s26 = sshll.u32 %s3613_s5, 4  ;;  %s2961_s17 = smov [#allocation11]   ;;  %s418_s26 = int_to_ptr.hbm [resolvable:$true] %s417_s26 }
  0x1e   : > { %s451_s18 = sshll.u32 %s3615_s9, 4  ;;  %s453_s22 = sshll.u32 %s2961_s17, 4  ;;  %s452_s18 = int_to_ptr.hbm [resolvable:$true] %s451_s18  ;;  %s454_s22 = int_to_ptr.vmem [resolvable:$true] %s453_s22 }
  0x1f   : > { %2546 = dma.hbm_to_vmem [thread:$0]  (!%p3083_p6), %s384_s19, 1024, %s386_s23, [#allocation6], %s3600_s13, %s3600_s13, %s3601_s14  }
  0x20   : > { %2552 = dma.hbm_to_vmem [thread:$0]  (!%p3083_p6), %s418_s26, 1024, %s420_s1, [#allocation9], %s3600_s13, %s3600_s13, %s3601_s14  }
  0x21   : > { %2558 = dma.hbm_to_vmem [thread:$0]  (!%p3083_p6), %s452_s18, 1024, %s454_s22, [#allocation12], %s3600_s13, %s3600_s13, %s3601_s14  }
  0x22   : > { %s400_s28 = sshll.u32 %s3616_s3, 4  ;;  %s2962_s19 = smov [#allocation7]   ;;  %s401_s28 = int_to_ptr.hbm [resolvable:$true] %s400_s28 }
  0x23   : > { %s402_s23 = sshll.u32 %s2962_s19, 4  ;;  %s3617_s7 = sld [smem:[#allocation28_spill]]  ;;  %s403_s23 = int_to_ptr.vmem [resolvable:$true] %s402_s23 }
  0x24   : > { %2549 = dma.hbm_to_vmem [thread:$0]  (!%p3083_p6), %s401_s28, 1024, %s403_s23, [#allocation6], %s3600_s13, %s3600_s13, %s3601_s14  }
  0x25   : > { %s3618_s11 = sld [smem:[#allocation30_spill]]  ;;  %s2963_s17 = smov [#allocation10]  }
  0x26   : > { %s436_s5 = sshll.u32 %s2963_s17, 4  ;;  %s2964_s28 = smov [#allocation13]   ;;  %s437_s5 = int_to_ptr.vmem [resolvable:$true] %s436_s5 }
  0x27   : > { %s470_s22 = sshll.u32 %s2964_s28, 4  ;;  %s2144_s19 = sadd.s32 4294967294, %s2955_s16   ;;  %s471_s22 = int_to_ptr.vmem [resolvable:$true] %s470_s22 }
  0x28   : > { %s3131_s23 = sadd.s32 1, %s2955_s16   ;;  %s44_s24 = sadd.s32 1, %s2951_s15 }
  0x29   : > { %s434_s26 = sshll.u32 %s3617_s7, 4  ;;  %s41_s1 = ssub.s32 %s2955_s16, %s3131_s23  ;;  %s435_s26 = int_to_ptr.hbm [resolvable:$true] %s434_s26 }
  0x2a   : > { %2555 = dma.hbm_to_vmem [thread:$0]  (!%p3083_p6), %s435_s26, 1024, %s437_s5, [#allocation9], %s3600_s13, %s3600_s13, %s3601_s14  }
  0x2b   : > { %s468_s25 = sshll.u32 %s3618_s11, 4  ;;  %p42_p7 = scmp.eq.s32.totalorder %s41_s1, 0  ;;  %s469_s25 = int_to_ptr.hbm [resolvable:$true] %s468_s25 }
  0x2c   : > { %2561 = dma.hbm_to_vmem [thread:$0]  (!%p3083_p6), %s469_s25, 1024, %s471_s22, [#allocation12], %s3600_s13, %s3600_s13, %s3601_s14  }
  0x2d   : > { %p51_p8 = scmp.ne.s32.totalorder %s2951_s15, %s2947_s30  ;;  %p52_p9 = scmp.eq.s32.totalorder %s2955_s16, 0 }
  0x2e   : > { %p57_p10 = scmp.ne.s32.totalorder %s2947_s30, %s2943_s29  ;;  %p333_p13 = scmp.eq.s32.totalorder %s3066_s20, 1 }
  0x2f   : > { %s3142_s26 = scalar_select %p42_p7, %s2951_s15, %s44_s24  }
  0x30   : > { %p3144_p11 = por %p52_p9, %p51_p8  ;;  %p3150_p12 = por %p58_p1, %p57_p10 }
  0x31   : > { %3619 = sst [smem:[#allocation23_spill]] %s3142_s26  ;;  %p339_p0 = scmp.eq.s32.totalorder %s2144_s19, 1 }
  0x32   : > { %p2579_p2 = scmp.lt.s32.totalorder %s2955_s16, 2  ;;  %s487_s25 = sand.u32 1, %s2951_s15  }
  0x33   : > { %p3157_p4 = por %p333_p13, %p51_p8  ;;  %p3161_p6 = por %p339_p0, %p57_p10 }
  0x34   : > { %s2153_s28 = sshll.u32 %s487_s25, 7  ;;  %s2430_s22 = sshll.u32 %s2955_s16, 7 }
  0x35   : > { %s3624_s0 = sld [smem:[#allocation24_spill]]  ;;  %s491_s14 = scalar_lea.vmem [#allocation2], %s2153_s28 }
  0x36   : > { %s499_s3 = sshll.u32 %s491_s14, 4  ;;  %p3171_p7 = pnand %p2579_p2, %p3144_p11  ;;  %s500_s3 = int_to_ptr.vmem [resolvable:$true] %s499_s3 }
  0x37   : > { %s488_s9 = scalar_lea.sflag [#allocation3], %s487_s25 }
  0x38   : > { %p2819_p9 = pneg %p3171_p7 }
  0x3b   : > { %s496_s13 = scalar_lea.hbm %s3624_s0, %s2430_s22 }
  0x3c   : > { %s497_s7 = sshll.u32 %s496_s13, 4  ;;  %s2822_s13 = scalar_lea.hbm %s3624_s0, 256  ;;  %s498_s7 = int_to_ptr.hbm [resolvable:$true] %s497_s7 }
  0x3d   : > { %s2815_s11 = sshra.s32 %s498_s7, 4  ;;  %s2816_s11 = int_to_ptr.hbm [resolvable:$true] %s2815_s11 }
  0x3e   : > { %s2817_s26 = scalar_lea.hbm %s2816_s11, 128  ;;  %p2823_p11 = scmp.lt.s32.totalorder %s2816_s11, %s3624_s0 }
  0x3f   : > { %p2818_p8 = scmp.ne.s32.totalorder %s2816_s11, %s2817_s26  ;;  %p2824_p0 = scmp.lt.s32.totalorder %s2822_s13, %s2817_s26 }
  0x41   : > { %p2820_p10 = pnand %p2819_p9, %p2818_p8  ;;  %p2825_p2 = por %p2824_p0, %p2823_p11 }
  0x43   : > { %p2821_p13 = pneg %p2820_p10 }
  0x45   : > { %p2826_p5 = pnand %p2825_p2, %p2821_p13 }
  0x47   : > { %2829 = shalt.err (!%p2826_p5)
}
  0x48   : > { %s3626_s25 = smov 4   ;;  %s3627_s1 = smov 64  }
  0x49   : > { %2565 = dma.hbm_to_vmem [thread:$0]  (!%p3171_p7), %s498_s7, 2048, %s500_s3, %s488_s9, %s3627_s1, %s3627_s1, %s3626_s25  }
  0x4a   : > { %511 = sbr.rel (%p3071_p3) target bundleno = 1207 (0x4b7), region = 72  ;;  %s3191_s24 = sand.u32 (!%p3071_p3), 1, %s2947_s30  }
  0x4b   : > { %s2157_s11 = sshll.u32 (!%p3071_p3), %s3191_s24, 7  ;;  %s514_s26 = scalar_lea.sflag (!%p3071_p3), [#allocation3], %s3191_s24 }
  0x4c   : > { %s3195_s28 = scalar_lea.vmem (!%p3071_p3), [#allocation2], %s2157_s11 }
  0x4f   : > { %2918 = dma.done.wait (%p3150_p12), %s514_s26, 2048  }
  0x50   : > { %2920 = vsyncadd (%p3150_p12), %s514_s26, 4294965248 }
  0x51   : > { %2922 = dma.done.wait (%p58_p1), [#allocation6], 2048  }
  0x52   : > { %2924 = vsyncadd (%p58_p1), [#allocation6], 4294965248 }
  0x53   : > { %2926 = dma.done.wait (%p58_p1), [#allocation9], 2048  }
  0x54   : > { %2928 = vsyncadd (%p58_p1), [#allocation9], 4294965248 }
  0x55   : > { %2930 = dma.done.wait (%p58_p1), [#allocation12], 2048  }
  0x56   : > { %2932 = vsyncadd (%p58_p1), [#allocation12], 4294965248  ;;  %v2454_v0 = vld [vmem:[#allocation5 + $0x38] sm:$0xff]  ;;  %v2453_v1 = vld [vmem:[#allocation5 + $0x30] sm:$0xff]  ;;  %s2164_s18 = sshll.u32 %s3191_s24, 8  ;;  %s2495_s3 = sshll.u32 %s3066_s20, 8 }
  0x57   : > { %797 = vmatpush.bf16.msra.mxu0 %v2454_v0  ;;  %2497 = vmatpush.bf16.msra.mxu2 %v2454_v0  ;;  %v2452_v2 = vld [vmem:[#allocation5 + $0x28] sm:$0xff]  ;;  %v2451_v3 = vld [vmem:[#allocation5 + $0x20] sm:$0xff]  ;;  %v2450_v4 = vld [vmem:[#allocation5 + $0x18] sm:$0xff]  ;;  %s3300_s13 = scalar_lea.vmem [#allocation15], %s2164_s18  ;;  %s3628_s21 = sld [smem:[#allocation32_spill]] }
  0x58   : > { %v2449_v5 = vld [vmem:[#allocation5 + $0x10] sm:$0xff]  ;;  %v2448_v6 = vld [vmem:[#allocation5 + $0x8] sm:$0xff]  ;;  %v2447_v7 = vld [vmem:[#allocation5] sm:$0xff]  ;;  %s1978_s19 = sshll.u32 %s3300_s13, 4  ;;  %s1949_s22 = scalar_lea.sflag [#allocation16], %s3191_s24  ;;  %s1979_s19 = int_to_ptr.vmem [resolvable:$true] %s1978_s19 }
  0x59   : > { %v2431_v8 = vld [vmem:[%s3195_s28] sm:$0xff]  ;;  %v2432_v9 = vld [vmem:[%s3195_s28 + $0x8] sm:$0xff]  ;;  %v2433_v10 = vld [vmem:[%s3195_s28 + $0x10] sm:$0xff] }
  0x5a   : > { %v2434_v11 = vld [vmem:[%s3195_s28 + $0x18] sm:$0xff]  ;;  %v2435_v12 = vld [vmem:[%s3195_s28 + $0x20] sm:$0xff]  ;;  %v2436_v15 = vld [vmem:[%s3195_s28 + $0x28] sm:$0xff] }
  0x5b   : > { %798 = vmatpush.bf16.msra.mxu0 %v2453_v1  ;;  %2498 = vmatpush.bf16.msra.mxu2 %v2453_v1  ;;  %v2439_v13 = vld [vmem:[%s3195_s28 + $0x40] sm:$0xff]  ;;  %v2462_v14 = vld [vmem:[#allocation7 + $0x38] sm:$0xff]  ;;  %v2461_v16 = vld [vmem:[#allocation7 + $0x30] sm:$0xff] }
  0x5c   : > { %1002 = vmatpush.bf16.msra.mxu1 %v2462_v14  ;;  %2505 = vmatpush.bf16.msra.mxu3 %v2462_v14  ;;  %v2440_v17 = vld [vmem:[%s3195_s28 + $0x48] sm:$0xff]  ;;  %v2459_v19 = vld [vmem:[#allocation7 + $0x20] sm:$0xff]  ;;  %v2458_v20 = vld [vmem:[#allocation7 + $0x18] sm:$0xff] }
  0x5d   : > { %v2460_v18 = vld [vmem:[#allocation7 + $0x28] sm:$0xff]  ;;  %v2437_v21 = vld [vmem:[%s3195_s28 + $0x30] sm:$0xff]  ;;  %v2455_v25 = vld [vmem:[#allocation7] sm:$0xff]  ;;  %s2865_s26 = scalar_lea.hbm %s3628_s21, 512 }
  0x5e   : > { %v2457_v22 = vld [vmem:[#allocation7 + $0x10] sm:$0xff]  ;;  %v2456_v24 = vld [vmem:[#allocation7 + $0x8] sm:$0xff]  ;;  %v2438_v26 = vld [vmem:[%s3195_s28 + $0x38] sm:$0xff] }
  0x5f   : > { %799 = vmatpush.bf16.msra.mxu0 %v2452_v2  ;;  %2499 = vmatpush.bf16.msra.mxu2 %v2452_v2  ;;  %v2441_v23 = vld [vmem:[%s3195_s28 + $0x50] sm:$0xff]  ;;  %v2442_v27 = vld [vmem:[%s3195_s28 + $0x58] sm:$0xff]  ;;  %v3228_v30 = vld [vmem:[%s3585_s2] ss:$0 sm:$0xff] }
  0x60   : > { %1003 = vmatpush.bf16.msra.mxu1 %v2461_v16  ;;  %2506 = vmatpush.bf16.msra.mxu3 %v2461_v16  ;;  %v2470_v28 = vld [vmem:[#allocation8 + $0x38] sm:$0xff]  ;;  %v2443_v31 = vld [vmem:[%s3195_s28 + $0x60] sm:$0xff]  ;;  %v2469_v37 = vld [vmem:[#allocation8 + $0x30] sm:$0xff] }
  0x61   : > { %v2444_v40 = vld [vmem:[%s3195_s28 + $0x68] sm:$0xff]  ;;  %v2445_v49 = vld [vmem:[%s3195_s28 + $0x70] sm:$0xff]  ;;  %v2467_v55 = vld [vmem:[#allocation8 + $0x20] sm:$0xff] }
  0x62   : > { %v2468_v46 = vld [vmem:[#allocation8 + $0x28] sm:$0xff]  ;;  %v2446_v58 = vld [vmem:[%s3195_s28 + $0x78] sm:$0xff]  ;;  %s3445_s28 = scalar_lea.vmem [#allocation14], %s2164_s18  ;;  %s1977_s18 = scalar_lea.hbm %s3628_s21, %s2495_s3 }
  0x63   : > { %800 = vmatpush.bf16.msra.mxu0 %v2451_v3  ;;  %2500 = vmatpush.bf16.msra.mxu2 %v2451_v3  ;;  %v2466_v0 = vld [vmem:[#allocation8 + $0x18] sm:$0xff]  ;;  %s1980_s14 = sshll.u32 %s1977_s18, 4  ;;  %s1981_s14 = int_to_ptr.hbm [resolvable:$true] %s1980_s14 }
  0x64   : > { %1004 = vmatpush.bf16.msra.mxu1 %v2460_v18  ;;  %2507 = vmatpush.bf16.msra.mxu3 %v2460_v18  ;;  %s2859_s27 = sshra.s32 %s1981_s14, 4  ;;  %s2860_s27 = int_to_ptr.hbm [resolvable:$true] %s2859_s27 }
  0x65   : > { %s2861_s25 = scalar_lea.hbm %s2860_s27, 256  ;;  %p2866_p12 = scmp.lt.s32.totalorder %s2860_s27, %s3628_s21 }
  0x66   : > { %p2862_p1 = scmp.ne.s32.totalorder %s2860_s27, %s2861_s25  ;;  %p2867_p7 = scmp.lt.s32.totalorder %s2865_s26, %s2861_s25 }
  0x67   : > { %801 = vmatpush.bf16.msra.mxu0 %v2450_v4  ;;  %2501 = vmatpush.bf16.msra.mxu2 %v2450_v4 }
  0x68   : > { %1005 = vmatpush.bf16.msra.mxu1 %v2459_v19  ;;  %2508 = vmatpush.bf16.msra.mxu3 %v2459_v19  ;;  %p2863_p3 = pnand %p2862_p1, %p3157_p4  ;;  %p2868_p8 = por %p2867_p7, %p2866_p12 }
  0x6a   : > { %p2864_p5 = pneg %p2863_p3 }
  0x6b   : > { %802 = vmatpush.bf16.msra.mxu0 %v2449_v5  ;;  %2502 = vmatpush.bf16.msra.mxu2 %v2449_v5 }
  0x6c   : > { %1006 = vmatpush.bf16.msra.mxu1 %v2458_v20  ;;  %2509 = vmatpush.bf16.msra.mxu3 %v2458_v20  ;;  %p2869_p9 = pnand %p2868_p8, %p2864_p5 }
  0x6f   : > { %803 = vmatpush.bf16.msra.mxu0 %v2448_v6  ;;  %2503 = vmatpush.bf16.msra.mxu2 %v2448_v6 }
  0x70   : > { %1007 = vmatpush.bf16.msra.mxu1 %v2457_v22  ;;  %2510 = vmatpush.bf16.msra.mxu3 %v2457_v22 }
  0x73   : > { %804 = vmatpush.bf16.msra.mxu0 %v2447_v7  ;;  %2504 = vmatpush.bf16.msra.mxu2 %v2447_v7 }
  0x74   : > { %1008 = vmatpush.bf16.msra.mxu1 %v2456_v24  ;;  %2511 = vmatpush.bf16.msra.mxu3 %v2456_v24  ;;  %v2464_v24 = vld [vmem:[#allocation8 + $0x8] sm:$0xff] }
  0x76   : > { %805 = vmatmul.bf16.vlgmr.msra.gmra.mxu0 %v2431_v8  ;;  %845 = vmatmul.bf16.vlgmr.msra.gmra.mxu2 %v2439_v13 }
  0x77   : > { %1207 = vmatpush.bf16.msrb.mxu2 %v2470_v28 }
  0x78   : > { %1009 = vmatpush.bf16.msra.mxu1 %v2455_v25  ;;  %2512 = vmatpush.bf16.msra.mxu3 %v2455_v25 }
  0x7b   : > { %1208 = vmatpush.bf16.msrb.mxu2 %v2469_v37 }
  0x7f   : > { %1209 = vmatpush.bf16.msrb.mxu2 %v2468_v46 }
  0x83   : > { %1210 = vmatpush.bf16.msrb.mxu2 %v2467_v55 }
  0x86   : > { %810 = vmatmul.bf16.gmra.mxu0 %v2432_v9  ;;  %850 = vmatmul.bf16.gmra.mxu2 %v2440_v17  ;;  %v2465_v9 = vld [vmem:[#allocation8 + $0x10] sm:$0xff] }
  0x87   : > { %1211 = vmatpush.bf16.msrb.mxu2 %v2466_v0 }
  0x8b   : > { %1212 = vmatpush.bf16.msrb.mxu2 %v2465_v9 }
  0x8f   : > { %1213 = vmatpush.bf16.msrb.mxu2 %v2464_v24 }
  0x96   : > { %815 = vmatmul.bf16.gmra.mxu0 %v2433_v10  ;;  %855 = vmatmul.bf16.gmra.mxu2 %v2441_v23 }
  0xa6   : > { %820 = vmatmul.bf16.gmra.mxu0 %v2434_v11  ;;  %860 = vmatmul.bf16.gmra.mxu2 %v2442_v27  ;;  %v2463_v27 = vld [vmem:[#allocation8] sm:$0xff] }
  0xa7   : > { %1214 = vmatpush.bf16.msrb.mxu2 %v2463_v27 }
  0xb6   : > { %825 = vmatmul.bf16.gmra.mxu0 %v2435_v12  ;;  %865 = vmatmul.bf16.gmra.mxu2 %v2443_v31 }
  0xc6   : > { %830 = vmatmul.bf16.gmra.mxu0 %v2436_v15  ;;  %870 = vmatmul.bf16.gmra.mxu2 %v2444_v40 }
  0xd6   : > { %835 = vmatmul.bf16.gmra.mxu0 %v2437_v21  ;;  %875 = vmatmul.bf16.gmra.mxu2 %v2445_v49 }
  0xe6   : > { %840 = vmatmul.bf16.gmra.mxu0 %v2438_v26  ;;  %880 = vmatmul.bf16.gmra.mxu2 %v2446_v58 }
  0xf3   : > { %v806_v29 = vpop.f32.mrf.mxu0 }
  0xf4   : > { %v807_v32 = vadd.f32 %v3228_v30, %v806_v29 }
  0xf6   : > { %v886_v35 = vmax.f32 %v807_v32, 0.0 }
  0xf9   : > { %v846_v6 = vpop.f32.mrf.mxu2 }
  0xfa   : > { %v847_v11 = vadd.f32 %v3228_v30, %v846_v6 }
  0xfb   : > { %v808_v33 = vpop.f32.mrf.mxu0 }
  0xfc   : > { %v809_v34 = vadd.f32 %v3228_v30, %v808_v33  ;;  %v902_v14 = vmax.f32 %v847_v11, 0.0 }
  0xfe   : > { %v887_v36 = vmax.f32 %v809_v34, 0.0 }
 0x100   : > { %v918_v38 = vpack.c.bf16 %v887_v36, %v886_v35 }
 0x101   : > { %v848_v13 = vpop.f32.mrf.mxu2 }
 0x102   : > { %1010 = vmatmul.bf16.vlgmr.msra.gmra.mxu1 %v918_v38  ;;  %v849_v15 = vadd.f32 %v3228_v30, %v848_v13 }
 0x103   : > { %v811_v39 = vpop.f32.mrf.mxu0 }
 0x104   : > { %v812_v41 = vadd.f32 %v3228_v30, %v811_v39  ;;  %v903_v16 = vmax.f32 %v849_v15, 0.0  ;;  %v2477_v15 = vld [vmem:[#allocation10 + $0x30] sm:$0xff] }
 0x106   : > { %v888_v44 = vmax.f32 %v812_v41, 0.0  ;;  %v926_v18 = vpack.c.bf16 %v903_v16, %v902_v14 }
 0x108   : > { %1050 = vmatmul.bf16.vlgmr.msra.gmra.mxu3 %v926_v18 }
 0x109   : > { %v851_v21 = vpop.f32.mrf.mxu2 }
 0x10a   : > { %v852_v26 = vadd.f32 %v3228_v30, %v851_v21 }
 0x10b   : > { %v813_v42 = vpop.f32.mrf.mxu0 }
 0x10c   : > { %v814_v43 = vadd.f32 %v3228_v30, %v813_v42  ;;  %v904_v31 = vmax.f32 %v852_v26, 0.0 }
 0x10e   : > { %v889_v45 = vmax.f32 %v814_v43, 0.0 }
 0x110   : > { %v919_v47 = vpack.c.bf16 %v889_v45, %v888_v44 }
 0x111   : > { %v853_v29 = vpop.f32.mrf.mxu2 }
 0x112   : > { %1015 = vmatmul.bf16.gmra.mxu1 %v919_v47  ;;  %v854_v32 = vadd.f32 %v3228_v30, %v853_v29 }
 0x113   : > { %v816_v48 = vpop.f32.mrf.mxu0 }
 0x114   : > { %v817_v50 = vadd.f32 %v3228_v30, %v816_v48  ;;  %v905_v33 = vmax.f32 %v854_v32, 0.0 }
 0x116   : > { %v890_v53 = vmax.f32 %v817_v50, 0.0  ;;  %v927_v35 = vpack.c.bf16 %v905_v33, %v904_v31  ;;  %v2476_v31 = vld [vmem:[#allocation10 + $0x28] sm:$0xff] }
 0x118   : > { %1055 = vmatmul.bf16.gmra.mxu3 %v927_v35 }
 0x119   : > { %v856_v38 = vpop.f32.mrf.mxu2 }
 0x11a   : > { %v857_v42 = vadd.f32 %v3228_v30, %v856_v38 }
 0x11b   : > { %v818_v51 = vpop.f32.mrf.mxu0 }
 0x11c   : > { %v819_v52 = vadd.f32 %v3228_v30, %v818_v51  ;;  %v906_v45 = vmax.f32 %v857_v42, 0.0 }
 0x11e   : > { %v891_v54 = vmax.f32 %v819_v52, 0.0 }
 0x120   : > { %v920_v56 = vpack.c.bf16 %v891_v54, %v890_v53 }
 0x121   : > { %v858_v44 = vpop.f32.mrf.mxu2 }
 0x122   : > { %1020 = vmatmul.bf16.gmra.mxu1 %v920_v56  ;;  %v859_v46 = vadd.f32 %v3228_v30, %v858_v44 }
 0x123   : > { %v821_v57 = vpop.f32.mrf.mxu0 }
 0x124   : > { %v822_v59 = vadd.f32 %v3228_v30, %v821_v57  ;;  %v907_v47 = vmax.f32 %v859_v46, 0.0  ;;  %v2475_v46 = vld [vmem:[#allocation10 + $0x20] sm:$0xff] }
 0x126   : > { %v892_v62 = vmax.f32 %v822_v59, 0.0  ;;  %v928_v49 = vpack.c.bf16 %v907_v47, %v906_v45 }
 0x128   : > { %1060 = vmatmul.bf16.gmra.mxu3 %v928_v49 }
 0x129   : > { %v861_v52 = vpop.f32.mrf.mxu2 }
 0x12a   : > { %v862_v56 = vadd.f32 %v3228_v30, %v861_v52 }
 0x12b   : > { %v823_v60 = vpop.f32.mrf.mxu0 }
 0x12c   : > { %v824_v61 = vadd.f32 %v3228_v30, %v823_v60  ;;  %v908_v58 = vmax.f32 %v862_v56, 0.0 }
 0x12e   : > { %v893_v63 = vmax.f32 %v824_v61, 0.0 }
 0x130   : > { %v921_v1 = vpack.c.bf16 %v893_v63, %v892_v62  ;;  %v2478_v63 = vld [vmem:[#allocation10 + $0x38] sm:$0xff] }
 0x131   : > { %v863_v57 = vpop.f32.mrf.mxu2  ;;  %1380 = vmatpush.bf16.msrb.mxu3 %v2478_v63 }
 0x132   : > { %1025 = vmatmul.bf16.gmra.mxu1 %v921_v1  ;;  %v864_v59 = vadd.f32 %v3228_v30, %v863_v57  ;;  %v3261_v1 = vld [vmem:[%s3587_s4] ss:$0 sm:$0xff] }
 0x133   : > { %v826_v2 = vpop.f32.mrf.mxu0 }
 0x134   : > { %v827_v3 = vadd.f32 %v3228_v30, %v826_v2  ;;  %v909_v60 = vmax.f32 %v864_v59, 0.0 }
 0x135   : > { %1381 = vmatpush.bf16.msrb.mxu3 %v2477_v15 }
 0x136   : > { %v894_v7 = vmax.f32 %v827_v3, 0.0  ;;  %v929_v61 = vpack.c.bf16 %v909_v60, %v908_v58  ;;  %v2474_v60 = vld [vmem:[#allocation10 + $0x18] sm:$0xff] }
 0x138   : > { %1065 = vmatmul.bf16.gmra.mxu3 %v929_v61 }
 0x139   : > { %v866_v62 = vpop.f32.mrf.mxu2  ;;  %1382 = vmatpush.bf16.msrb.mxu3 %v2476_v31 }
 0x13a   : > { %v867_v2 = vadd.f32 %v3228_v30, %v866_v62 }
 0x13b   : > { %v828_v4 = vpop.f32.mrf.mxu0 }
 0x13c   : > { %v829_v5 = vadd.f32 %v3228_v30, %v828_v4 }
 0x13d   : > { %1383 = vmatpush.bf16.msrb.mxu3 %v2475_v46 }
 0x13e   : > { %v895_v8 = vmax.f32 %v829_v5, 0.0  ;;  %v910_v5 = vmax.f32 %v867_v2, 0.0 }
 0x140   : > { %v922_v10 = vpack.c.bf16 %v895_v8, %v894_v7 }
 0x141   : > { %v868_v3 = vpop.f32.mrf.mxu2  ;;  %1384 = vmatpush.bf16.msrb.mxu3 %v2474_v60 }
 0x142   : > { %1030 = vmatmul.bf16.gmra.mxu1 %v922_v10  ;;  %v869_v6 = vadd.f32 %v3228_v30, %v868_v3 }
 0x143   : > { %v831_v12 = vpop.f32.mrf.mxu0 }
 0x144   : > { %v832_v17 = vadd.f32 %v3228_v30, %v831_v12  ;;  %v911_v9 = vmax.f32 %v869_v6, 0.0 }
 0x146   : > { %v896_v22 = vmax.f32 %v832_v17, 0.0  ;;  %v930_v12 = vpack.c.bf16 %v911_v9, %v910_v5 }
 0x148   : > { %1070 = vmatmul.bf16.gmra.mxu3 %v930_v12 }
 0x149   : > { %v871_v14 = vpop.f32.mrf.mxu2 }
 0x14a   : > { %v872_v17 = vadd.f32 %v3228_v30, %v871_v14 }
 0x14b   : > { %v833_v19 = vpop.f32.mrf.mxu0 }
 0x14c   : > { %v834_v20 = vadd.f32 %v3228_v30, %v833_v19 }
 0x14e   : > { %v897_v23 = vmax.f32 %v834_v20, 0.0  ;;  %v912_v20 = vmax.f32 %v872_v17, 0.0 }
 0x150   : > { %v923_v25 = vpack.c.bf16 %v897_v23, %v896_v22 }
 0x151   : > { %v873_v18 = vpop.f32.mrf.mxu2 }
 0x152   : > { %1035 = vmatmul.bf16.gmra.mxu1 %v923_v25  ;;  %v874_v21 = vadd.f32 %v3228_v30, %v873_v18 }
 0x153   : > { %v836_v28 = vpop.f32.mrf.mxu0 }
 0x154   : > { %v837_v34 = vadd.f32 %v3228_v30, %v836_v28  ;;  %v913_v24 = vmax.f32 %v874_v21, 0.0 }
 0x156   : > { %v898_v39 = vmax.f32 %v837_v34, 0.0  ;;  %v931_v27 = vpack.c.bf16 %v913_v24, %v912_v20 }
 0x158   : > { %1075 = vmatmul.bf16.gmra.mxu3 %v931_v27 }
 0x159   : > { %v876_v29 = vpop.f32.mrf.mxu2 }
 0x15a   : > { %v877_v33 = vadd.f32 %v3228_v30, %v876_v29 }
 0x15b   : > { %v838_v36 = vpop.f32.mrf.mxu0 }
 0x15c   : > { %v839_v37 = vadd.f32 %v3228_v30, %v838_v36  ;;  %v914_v36 = vmax.f32 %v877_v33, 0.0 }
 0x15e   : > { %v899_v40 = vmax.f32 %v839_v37, 0.0 }
 0x160   : > { %v924_v41 = vpack.c.bf16 %v899_v40, %v898_v39 }
 0x161   : > { %v878_v34 = vpop.f32.mrf.mxu2 }
 0x162   : > { %1040 = vmatmul.bf16.gmra.mxu1 %v924_v41  ;;  %v879_v37 = vadd.f32 %v3228_v30, %v878_v34 }
 0x163   : > { %v841_v43 = vpop.f32.mrf.mxu0 }
 0x164   : > { %v842_v48 = vadd.f32 %v3228_v30, %v841_v43  ;;  %v915_v40 = vmax.f32 %v879_v37, 0.0 }
 0x166   : > { %v900_v53 = vmax.f32 %v842_v48, 0.0  ;;  %v932_v43 = vpack.c.bf16 %v915_v40, %v914_v36  ;;  %v3293_v40 = vld [vmem:[%s3589_s6] ss:$0 sm:$0xff] }
 0x168   : > { %1080 = vmatmul.bf16.gmra.mxu3 %v932_v43 }
 0x169   : > { %v881_v45 = vpop.f32.mrf.mxu2 }
 0x16a   : > { %v882_v48 = vadd.f32 %v3228_v30, %v881_v45 }
 0x16b   : > { %v843_v50 = vpop.f32.mrf.mxu0 }
 0x16c   : > { %v844_v51 = vadd.f32 %v3228_v30, %v843_v50 }
 0x16e   : > { %v901_v54 = vmax.f32 %v844_v51, 0.0  ;;  %v916_v51 = vmax.f32 %v882_v48, 0.0 }
 0x170   : > { %v925_v55 = vpack.c.bf16 %v901_v54, %v900_v53 }
 0x171   : > { %v883_v49 = vpop.f32.mrf.mxu2 }
 0x172   : > { %1045 = vmatmul.bf16.gmra.mxu1 %v925_v55  ;;  %v884_v52 = vadd.f32 %v3228_v30, %v883_v49 }
 0x174   : > { %v917_v55 = vmax.f32 %v884_v52, 0.0 }
 0x176   : > { %v933_v58 = vpack.c.bf16 %v917_v55, %v916_v51 }
 0x178   : > { %1085 = vmatmul.bf16.gmra.mxu3 %v933_v58 }
 0x17f   : > { %v1011_v0 = vpop.f32.mrf.mxu1 }
 0x180   : > { %v1012_v4 = vadd.f32 %v3261_v1, %v1011_v0 }
 0x182   : > { %v1091_v10 = vmax.f32 %v1012_v4, 0.0  ;;  %v2473_v4 = vld [vmem:[#allocation10 + $0x10] sm:$0xff] }
 0x183   : > { %1385 = vmatpush.bf16.msrb.mxu3 %v2473_v4 }
 0x187   : > { %v1013_v7 = vpop.f32.mrf.mxu1 }
 0x188   : > { %v1014_v8 = vadd.f32 %v3261_v1, %v1013_v7 }
 0x18a   : > { %v1092_v11 = vmax.f32 %v1014_v8, 0.0 }
 0x18c   : > { %v1123_v13 = vpack.c.bf16 %v1092_v11, %v1091_v10  ;;  %v1051_v11 = vpop.f32.mrf.mxu3 }
 0x18d   : > { %v1052_v34 = vadd.f32 %v3261_v1, %v1051_v11 }
 0x18e   : > { %1215 = vmatmul.bf16.vlgmr.msrb.gmra.mxu2 %v1123_v13  ;;  %v2472_v13 = vld [vmem:[#allocation10 + $0x8] sm:$0xff] }
 0x18f   : > { %v1016_v16 = vpop.f32.mrf.mxu1  ;;  %1386 = vmatpush.bf16.msrb.mxu3 %v2472_v13  ;;  %v1107_v36 = vmax.f32 %v1052_v34, 0.0 }
 0x190   : > { %v1017_v19 = vadd.f32 %v3261_v1, %v1016_v16 }
 0x192   : > { %v1093_v25 = vmax.f32 %v1017_v19, 0.0 }
 0x194   : > { %v1053_v15 = vpop.f32.mrf.mxu3 }
 0x197   : > { %v1018_v22 = vpop.f32.mrf.mxu1 }
 0x198   : > { %v1019_v23 = vadd.f32 %v3261_v1, %v1018_v22  ;;  %v2471_v22 = vld [vmem:[#allocation10] sm:$0xff] }
 0x199   : > { %1387 = vmatpush.bf16.msrb.mxu3 %v2471_v22 }
 0x19a   : > { %v1094_v26 = vmax.f32 %v1019_v23, 0.0 }
 0x19c   : > { %v1124_v28 = vpack.c.bf16 %v1094_v26, %v1093_v25  ;;  %v1056_v24 = vpop.f32.mrf.mxu3 }
 0x19e   : > { %1220 = vmatmul.bf16.gmra.mxu2 %v1124_v28 }
 0x19f   : > { %v1021_v32 = vpop.f32.mrf.mxu1 }
 0x1a0   : > { %v1022_v35 = vadd.f32 %v3261_v1, %v1021_v32 }
 0x1a2   : > { %v1095_v41 = vmax.f32 %v1022_v35, 0.0  ;;  %v1054_v35 = vadd.f32 %v3261_v1, %v1053_v15 }
 0x1a4   : > { %v1058_v28 = vpop.f32.mrf.mxu3  ;;  %v1108_v37 = vmax.f32 %v1054_v35, 0.0 }
 0x1a5   : > { %v1059_v45 = vadd.f32 %v3261_v1, %v1058_v28 }
 0x1a7   : > { %v1023_v38 = vpop.f32.mrf.mxu1  ;;  %v1110_v48 = vmax.f32 %v1059_v45, 0.0 }
 0x1a8   : > { %v1024_v39 = vadd.f32 %v3261_v1, %v1023_v38  ;;  %v1131_v38 = vpack.c.bf16 %v1108_v37, %v1107_v36 }
 0x1aa   : > { %v1096_v42 = vmax.f32 %v1024_v39, 0.0 }
 0x1ac   : > { %v1125_v44 = vpack.c.bf16 %v1096_v42, %v1095_v41  ;;  %v1061_v33 = vpop.f32.mrf.mxu3  ;;  %v2486_v41 = vld [vmem:[#allocation11 + $0x38] sm:$0xff] }
 0x1ad   : > { %1585 = vmatpush.bf16.msrb.mxu0 %v2486_v41 }
 0x1ae   : > { %1225 = vmatmul.bf16.gmra.mxu2 %v1125_v44  ;;  %v1057_v44 = vadd.f32 %v3261_v1, %v1056_v24 }
 0x1af   : > { %v1026_v47 = vpop.f32.mrf.mxu1 }
 0x1b0   : > { %v1027_v50 = vadd.f32 %v3261_v1, %v1026_v47  ;;  %v1109_v47 = vmax.f32 %v1057_v44, 0.0 }
 0x1b2   : > { %v1097_v56 = vmax.f32 %v1027_v50, 0.0  ;;  %v1132_v52 = vpack.c.bf16 %v1110_v48, %v1109_v47 }
 0x1b4   : > { %v1063_v39 = vpop.f32.mrf.mxu3 }
 0x1b5   : > { %v1064_v58 = vadd.f32 %v3261_v1, %v1063_v39 }
 0x1b7   : > { %v1028_v53 = vpop.f32.mrf.mxu1  ;;  %v1112_v60 = vmax.f32 %v1064_v58, 0.0 }
 0x1b8   : > { %v1029_v54 = vadd.f32 %v3261_v1, %v1028_v53  ;;  %v2485_v53 = vld [vmem:[#allocation11 + $0x30] sm:$0xff] }
 0x1b9   : > { %1586 = vmatpush.bf16.msrb.mxu0 %v2485_v53 }
 0x1ba   : > { %v1098_v57 = vmax.f32 %v1029_v54, 0.0 }
 0x1bc   : > { %v1126_v59 = vpack.c.bf16 %v1098_v57, %v1097_v56  ;;  %v1066_v46 = vpop.f32.mrf.mxu3  ;;  %v1062_v57 = vadd.f32 %v3261_v1, %v1061_v33 }
 0x1be   : > { %1230 = vmatmul.bf16.gmra.mxu2 %v1126_v59  ;;  %v1111_v59 = vmax.f32 %v1062_v57, 0.0 }
 0x1bf   : > { %v1031_v61 = vpop.f32.mrf.mxu1 }
 0x1c0   : > { %v1032_v62 = vadd.f32 %v3261_v1, %v1031_v61 }
 0x1c2   : > { %v1099_v2 = vmax.f32 %v1032_v62, 0.0 }
 0x1c4   : > { %v1068_v55 = vpop.f32.mrf.mxu3 }
 0x1c7   : > { %v1033_v63 = vpop.f32.mrf.mxu1 }
 0x1c8   : > { %v1034_v0 = vadd.f32 %v3261_v1, %v1033_v63 }
 0x1ca   : > { %v1100_v30 = vmax.f32 %v1034_v0, 0.0  ;;  %v1133_v0 = vpack.c.bf16 %v1112_v60, %v1111_v59 }
 0x1cc   : > { %v1127_v3 = vpack.c.bf16 %v1100_v30, %v1099_v2  ;;  %v1071_v63 = vpop.f32.mrf.mxu3  ;;  %v2484_v30 = vld [vmem:[#allocation11 + $0x28] sm:$0xff] }
 0x1cd   : > { %1587 = vmatpush.bf16.msrb.mxu0 %v2484_v30  ;;  %v2479_v30 = vld [vmem:[#allocation11] sm:$0xff] }
 0x1ce   : > { %1235 = vmatmul.bf16.gmra.mxu2 %v1127_v3 }
 0x1cf   : > { %v1036_v5 = vpop.f32.mrf.mxu1 }
 0x1d0   : > { %v1037_v6 = vadd.f32 %v3261_v1, %v1036_v5  ;;  %v1067_v5 = vadd.f32 %v3261_v1, %v1066_v46 }
 0x1d2   : > { %v1101_v9 = vmax.f32 %v1037_v6, 0.0  ;;  %v1069_v6 = vadd.f32 %v3261_v1, %v1068_v55 }
 0x1d7   : > { %v1038_v7 = vpop.f32.mrf.mxu1 }
 0x1d8   : > { %v1039_v8 = vadd.f32 %v3261_v1, %v1038_v7  ;;  %v1073_v7 = vpop.f32.mrf.mxu3 }
 0x1da   : > { %v1102_v10 = vmax.f32 %v1039_v8, 0.0  ;;  %v1113_v8 = vmax.f32 %v1067_v5, 0.0 }
 0x1dc   : > { %v1128_v12 = vpack.c.bf16 %v1102_v10, %v1101_v9  ;;  %v1114_v9 = vmax.f32 %v1069_v6, 0.0 }
 0x1de   : > { %1240 = vmatmul.bf16.gmra.mxu2 %v1128_v12  ;;  %v1134_v12 = vpack.c.bf16 %v1114_v9, %v1113_v8 }
 0x1df   : > { %v1041_v14 = vpop.f32.mrf.mxu1 }
 0x1e0   : > { %v1042_v16 = vadd.f32 %v3261_v1, %v1041_v14  ;;  %v2483_v14 = vld [vmem:[#allocation11 + $0x20] sm:$0xff]  ;;  %v1076_v15 = vpop.f32.mrf.mxu3 }
 0x1e1   : > { %1588 = vmatpush.bf16.msrb.mxu0 %v2483_v14 }
 0x1e2   : > { %v1103_v19 = vmax.f32 %v1042_v16, 0.0 }
 0x1e7   : > { %v1043_v17 = vpop.f32.mrf.mxu1 }
 0x1e8   : > { %v1044_v18 = vadd.f32 %v3261_v1, %v1043_v17  ;;  %v1078_v22 = vpop.f32.mrf.mxu3 }
 0x1e9   : > { %v1079_v33 = vadd.f32 %v3261_v1, %v1078_v22 }
 0x1ea   : > { %v1104_v20 = vmax.f32 %v1044_v18, 0.0  ;;  %v1072_v18 = vadd.f32 %v3261_v1, %v1071_v63 }
 0x1eb   : > { %v1118_v35 = vmax.f32 %v1079_v33, 0.0 }
 0x1ec   : > { %v1129_v21 = vpack.c.bf16 %v1104_v20, %v1103_v19  ;;  %v1074_v19 = vadd.f32 %v3261_v1, %v1073_v7  ;;  %v1115_v20 = vmax.f32 %v1072_v18, 0.0 }
 0x1ee   : > { %1245 = vmatmul.bf16.gmra.mxu2 %v1129_v21  ;;  %v1116_v21 = vmax.f32 %v1074_v19, 0.0 }
 0x1ef   : > { %v1046_v23 = vpop.f32.mrf.mxu1 }
 0x1f0   : > { %v1047_v25 = vadd.f32 %v3261_v1, %v1046_v23 }
 0x1f2   : > { %v1105_v29 = vmax.f32 %v1047_v25, 0.0  ;;  %v1135_v25 = vpack.c.bf16 %v1116_v21, %v1115_v20 }
 0x1f7   : > { %v1048_v26 = vpop.f32.mrf.mxu1 }
 0x1f8   : > { %v1049_v27 = vadd.f32 %v3261_v1, %v1048_v26 }
 0x1fa   : > { %v1106_v31 = vmax.f32 %v1049_v27, 0.0  ;;  %v2482_v27 = vld [vmem:[#allocation11 + $0x18] sm:$0xff] }
 0x1fb   : > { %1589 = vmatpush.bf16.msrb.mxu0 %v2482_v27 }
 0x1fc   : > { %v1130_v32 = vpack.c.bf16 %v1106_v31, %v1105_v29  ;;  %v1081_v31 = vpop.f32.mrf.mxu3 }
 0x1fd   : > { %v1082_v45 = vadd.f32 %v3261_v1, %v1081_v31 }
 0x1fe   : > { %1250 = vmatmul.bf16.gmra.mxu2 %v1130_v32  ;;  %v1077_v32 = vadd.f32 %v3261_v1, %v1076_v15 }
 0x1ff   : > { %v1119_v48 = vmax.f32 %v1082_v45, 0.0 }
 0x200   : > { %v1117_v34 = vmax.f32 %v1077_v32, 0.0 }
 0x202   : > { %v1136_v39 = vpack.c.bf16 %v1118_v35, %v1117_v34 }
 0x204   : > { %v1083_v41 = vpop.f32.mrf.mxu3 }
 0x205   : > { %v1084_v46 = vadd.f32 %v3261_v1, %v1083_v41 }
 0x20c   : > { %v1086_v47 = vpop.f32.mrf.mxu3 }
 0x20d   : > { %v1087_v58 = vadd.f32 %v3261_v1, %v1086_v47 }
 0x20e   : > { %1255 = vmatmul.bf16.gmra.mxu2 %v1131_v38 }
 0x20f   : > { %v1121_v60 = vmax.f32 %v1087_v58, 0.0 }
 0x211   : > { %v1216_v42 = vpop.f32.mrf.mxu2 }
 0x212   : > { %v1217_v43 = vadd.f32 %v3293_v40, %v1216_v42  ;;  %v2481_v42 = vld [vmem:[#allocation11 + $0x10] sm:$0xff] }
 0x213   : > { %1590 = vmatpush.bf16.msrb.mxu0 %v2481_v42 }
 0x214   : > { %1911 = vst [vmem:[%s3300_s13] sm:$0xff] %v1217_v43  ;;  %v1088_v55 = vpop.f32.mrf.mxu3 }
 0x215   : > { %v1089_v59 = vadd.f32 %v3261_v1, %v1088_v55 }
 0x219   : > { %v1218_v49 = vpop.f32.mrf.mxu2 }
 0x21a   : > { %v1219_v50 = vadd.f32 %v3293_v40, %v1218_v49  ;;  %v1120_v49 = vmax.f32 %v1084_v46, 0.0 }
 0x21c   : > { %v1296_v51 = vpack.c.bf16 %v1219_v50, %v1217_v43  ;;  %1912 = vst [vmem:[%s3300_s13 + $0x8] sm:$0xff] %v1219_v50  ;;  %v1137_v53 = vpack.c.bf16 %v1120_v49, %v1119_v48 }
 0x21e   : > { %1260 = vmatmul.bf16.gmra.mxu2 %v1132_v52  ;;  %1388 = vmatmul.bf16.vlgmr.msrb.gmra.mxu3 %v1296_v51 }
 0x221   : > { %v1221_v54 = vpop.f32.mrf.mxu2 }
 0x222   : > { %v1222_v56 = vadd.f32 %v3293_v40, %v1221_v54  ;;  %v2480_v54 = vld [vmem:[#allocation11 + $0x8] sm:$0xff] }
 0x223   : > { %1591 = vmatpush.bf16.msrb.mxu0 %v2480_v54  ;;  %v2491_v54 = vld [vmem:[#allocation13 + $0x20] sm:$0xff] }
 0x224   : > { %1913 = vst [vmem:[%s3300_s13 + $0x10] sm:$0xff] %v1222_v56 }
 0x227   : > { %1592 = vmatpush.bf16.msrb.mxu0 %v2479_v30 }
 0x229   : > { %v1223_v61 = vpop.f32.mrf.mxu2 }
 0x22a   : > { %v1224_v62 = vadd.f32 %v3293_v40, %v1223_v61  ;;  %v1122_v61 = vmax.f32 %v1089_v59, 0.0 }
 0x22c   : > { %1914 = vst [vmem:[%s3300_s13 + $0x18] sm:$0xff] %v1224_v62  ;;  %v1297_v2 = vpack.c.bf16 %v1224_v62, %v1222_v56 }
 0x22e   : > { %1265 = vmatmul.bf16.gmra.mxu2 %v1133_v0  ;;  %1393 = vmatmul.bf16.gmra.mxu3 %v1297_v2  ;;  %v1138_v2 = vpack.c.bf16 %v1122_v61, %v1121_v60 }
 0x231   : > { %v1226_v3 = vpop.f32.mrf.mxu2 }
 0x232   : > { %v1227_v4 = vadd.f32 %v3293_v40, %v1226_v3 }
 0x234   : > { %1915 = vst [vmem:[%s3300_s13 + $0x20] sm:$0xff] %v1227_v4 }
 0x239   : > { %v1228_v10 = vpop.f32.mrf.mxu2 }
 0x23a   : > { %v1229_v11 = vadd.f32 %v3293_v40, %v1228_v10 }
 0x23c   : > { %1916 = vst [vmem:[%s3300_s13 + $0x28] sm:$0xff] %v1229_v11  ;;  %v1298_v13 = vpack.c.bf16 %v1229_v11, %v1227_v4 }
 0x23e   : > { %1270 = vmatmul.bf16.gmra.mxu2 %v1134_v12  ;;  %1398 = vmatmul.bf16.gmra.mxu3 %v1298_v13  ;;  %v2494_v12 = vld [vmem:[#allocation13 + $0x38] sm:$0xff] }
 0x23f   : > { %1790 = vmatpush.bf16.msrb.mxu1 %v2494_v12 }
 0x241   : > { %v1231_v16 = vpop.f32.mrf.mxu2 }
 0x242   : > { %v1232_v17 = vadd.f32 %v3293_v40, %v1231_v16  ;;  %v3354_v16 = vld [vmem:[%s3591_s8] ss:$0 sm:$0xff] }
 0x244   : > { %1917 = vst [vmem:[%s3300_s13 + $0x30] sm:$0xff] %v1232_v17 }
 0x249   : > { %v1233_v23 = vpop.f32.mrf.mxu2 }
 0x24a   : > { %v1234_v24 = vadd.f32 %v3293_v40, %v1233_v23 }
 0x24c   : > { %1918 = vst [vmem:[%s3300_s13 + $0x38] sm:$0xff] %v1234_v24  ;;  %v1299_v26 = vpack.c.bf16 %v1234_v24, %v1232_v17 }
 0x24e   : > { %1275 = vmatmul.bf16.gmra.mxu2 %v1135_v25  ;;  %1403 = vmatmul.bf16.gmra.mxu3 %v1299_v26  ;;  %v2493_v25 = vld [vmem:[#allocation13 + $0x30] sm:$0xff] }
 0x24f   : > { %1791 = vmatpush.bf16.msrb.mxu1 %v2493_v25 }
 0x251   : > { %v1236_v28 = vpop.f32.mrf.mxu2 }
 0x252   : > { %v1237_v29 = vadd.f32 %v3293_v40, %v1236_v28 }
 0x254   : > { %1919 = vst [vmem:[%s3300_s13 + $0x40] sm:$0xff] %v1237_v29 }
 0x259   : > { %v1238_v36 = vpop.f32.mrf.mxu2 }
 0x25a   : > { %v1239_v37 = vadd.f32 %v3293_v40, %v1238_v36 }
 0x25c   : > { %v1300_v38 = vpack.c.bf16 %v1239_v37, %v1237_v29  ;;  %1920 = vst [vmem:[%s3300_s13 + $0x48] sm:$0xff] %v1239_v37 }
 0x25e   : > { %1280 = vmatmul.bf16.gmra.mxu2 %v1136_v39  ;;  %1408 = vmatmul.bf16.gmra.mxu3 %v1300_v38  ;;  %v2492_v39 = vld [vmem:[#allocation13 + $0x28] sm:$0xff] }
 0x25f   : > { %1792 = vmatpush.bf16.msrb.mxu1 %v2492_v39 }
 0x261   : > { %v1241_v43 = vpop.f32.mrf.mxu2 }
 0x262   : > { %v1242_v44 = vadd.f32 %v3293_v40, %v1241_v43 }
 0x263   : > { %1793 = vmatpush.bf16.msrb.mxu1 %v2491_v54 }
 0x264   : > { %1921 = vst [vmem:[%s3300_s13 + $0x50] sm:$0xff] %v1242_v44 }
 0x269   : > { %v1243_v50 = vpop.f32.mrf.mxu2 }
 0x26a   : > { %v1244_v51 = vadd.f32 %v3293_v40, %v1243_v50 }
 0x26c   : > { %v1301_v52 = vpack.c.bf16 %v1244_v51, %v1242_v44  ;;  %1922 = vst [vmem:[%s3300_s13 + $0x58] sm:$0xff] %v1244_v51 }
 0x26e   : > { %1285 = vmatmul.bf16.gmra.mxu2 %v1137_v53  ;;  %1413 = vmatmul.bf16.gmra.mxu3 %v1301_v52 }
 0x271   : > { %v1246_v56 = vpop.f32.mrf.mxu2 }
 0x272   : > { %v1247_v57 = vadd.f32 %v3293_v40, %v1246_v56 }
 0x274   : > { %1923 = vst [vmem:[%s3300_s13 + $0x60] sm:$0xff] %v1247_v57 }
 0x279   : > { %v1248_v62 = vpop.f32.mrf.mxu2 }
 0x27a   : > { %v1249_v63 = vadd.f32 %v3293_v40, %v1248_v62 }
 0x27c   : > { %v1302_v0 = vpack.c.bf16 %v1249_v63, %v1247_v57  ;;  %1924 = vst [vmem:[%s3300_s13 + $0x68] sm:$0xff] %v1249_v63 }
 0x27e   : > { %1290 = vmatmul.bf16.gmra.mxu2 %v1138_v2  ;;  %1418 = vmatmul.bf16.gmra.mxu3 %v1302_v0 }
 0x281   : > { %v1251_v3 = vpop.f32.mrf.mxu2 }
 0x282   : > { %v1252_v4 = vadd.f32 %v3293_v40, %v1251_v3  ;;  %v2490_v3 = vld [vmem:[#allocation13 + $0x18] sm:$0xff] }
 0x283   : > { %1794 = vmatpush.bf16.msrb.mxu1 %v2490_v3 }
 0x284   : > { %1925 = vst [vmem:[%s3300_s13 + $0x70] sm:$0xff] %v1252_v4 }
 0x289   : > { %v1253_v1 = vpop.f32.mrf.mxu2 }
 0x28a   : > { %v1254_v5 = vadd.f32 %v3293_v40, %v1253_v1 }
 0x28c   : > { %v1303_v6 = vpack.c.bf16 %v1254_v5, %v1252_v4  ;;  %1926 = vst [vmem:[%s3300_s13 + $0x78] sm:$0xff] %v1254_v5 }
 0x28e   : > { %1423 = vmatmul.bf16.gmra.mxu3 %v1303_v6 }
 0x291   : > { %v1256_v7 = vpop.f32.mrf.mxu2 }
 0x292   : > { %v1257_v8 = vadd.f32 %v3293_v40, %v1256_v7 }
 0x294   : > { %1927 = vst [vmem:[%s3300_s13 + $0x80] sm:$0xff] %v1257_v8 }
 0x299   : > { %v1258_v9 = vpop.f32.mrf.mxu2 }
 0x29a   : > { %v1259_v10 = vadd.f32 %v3293_v40, %v1258_v9 }
 0x29c   : > { %v1304_v11 = vpack.c.bf16 %v1259_v10, %v1257_v8  ;;  %1928 = vst [vmem:[%s3300_s13 + $0x88] sm:$0xff] %v1259_v10 }
 0x29e   : > { %1428 = vmatmul.bf16.gmra.mxu3 %v1304_v11 }
 0x2a1   : > { %v1261_v13 = vpop.f32.mrf.mxu2  ;;  %v1389_v14 = vpop.f32.mrf.mxu3 }
 0x2a2   : > { %v1262_v15 = vadd.f32 %v3293_v40, %v1261_v13  ;;  %v1390_v17 = vadd.f32 %v3354_v16, %v1389_v14 }
 0x2a4   : > { %1929 = vst [vmem:[%s3300_s13 + $0x90] sm:$0xff] %v1262_v15  ;;  %v1469_v22 = vmax.f32 %v1390_v17, 0.0 }
 0x2a9   : > { %v1263_v18 = vpop.f32.mrf.mxu2  ;;  %v1391_v19 = vpop.f32.mrf.mxu3 }
 0x2aa   : > { %v1264_v20 = vadd.f32 %v3293_v40, %v1263_v18  ;;  %v1392_v21 = vadd.f32 %v3354_v16, %v1391_v19 }
 0x2ac   : > { %v1305_v23 = vpack.c.bf16 %v1264_v20, %v1262_v15  ;;  %1930 = vst [vmem:[%s3300_s13 + $0x98] sm:$0xff] %v1264_v20  ;;  %v1470_v24 = vmax.f32 %v1392_v21, 0.0  ;;  %v2489_v15 = vld [vmem:[#allocation13 + $0x10] sm:$0xff] }
 0x2ad   : > { %1795 = vmatpush.bf16.msrb.mxu1 %v2489_v15 }
 0x2ae   : > { %1433 = vmatmul.bf16.gmra.mxu3 %v1305_v23  ;;  %v1501_v26 = vpack.c.bf16 %v1470_v24, %v1469_v22 }
 0x2b0   : > { %1593 = vmatmul.bf16.vlgmr.msrb.gmra.mxu0 %v1501_v26 }
 0x2b1   : > { %v1266_v27 = vpop.f32.mrf.mxu2  ;;  %v1394_v28 = vpop.f32.mrf.mxu3 }
 0x2b2   : > { %v1267_v29 = vadd.f32 %v3293_v40, %v1266_v27  ;;  %v1395_v31 = vadd.f32 %v3354_v16, %v1394_v28 }
 0x2b4   : > { %1931 = vst [vmem:[%s3300_s13 + $0xa0] sm:$0xff] %v1267_v29  ;;  %v1471_v36 = vmax.f32 %v1395_v31, 0.0 }
 0x2b9   : > { %v1268_v32 = vpop.f32.mrf.mxu2  ;;  %v1396_v33 = vpop.f32.mrf.mxu3 }
 0x2ba   : > { %v1269_v34 = vadd.f32 %v3293_v40, %v1268_v32  ;;  %v1397_v35 = vadd.f32 %v3354_v16, %v1396_v33 }
 0x2bc   : > { %v1306_v37 = vpack.c.bf16 %v1269_v34, %v1267_v29  ;;  %1932 = vst [vmem:[%s3300_s13 + $0xa8] sm:$0xff] %v1269_v34  ;;  %v1472_v38 = vmax.f32 %v1397_v35, 0.0  ;;  %v2488_v29 = vld [vmem:[#allocation13 + $0x8] sm:$0xff] }
 0x2bd   : > { %1796 = vmatpush.bf16.msrb.mxu1 %v2488_v29 }
 0x2be   : > { %1438 = vmatmul.bf16.gmra.mxu3 %v1306_v37  ;;  %v1502_v41 = vpack.c.bf16 %v1472_v38, %v1471_v36 }
 0x2c0   : > { %1598 = vmatmul.bf16.gmra.mxu0 %v1502_v41 }
 0x2c1   : > { %v1271_v42 = vpop.f32.mrf.mxu2  ;;  %v1399_v43 = vpop.f32.mrf.mxu3 }
 0x2c2   : > { %v1272_v44 = vadd.f32 %v3293_v40, %v1271_v42  ;;  %v1400_v45 = vadd.f32 %v3354_v16, %v1399_v43 }
 0x2c4   : > { %1933 = vst [vmem:[%s3300_s13 + $0xb0] sm:$0xff] %v1272_v44  ;;  %v1473_v50 = vmax.f32 %v1400_v45, 0.0 }
 0x2c9   : > { %v1273_v46 = vpop.f32.mrf.mxu2  ;;  %v1401_v47 = vpop.f32.mrf.mxu3 }
 0x2ca   : > { %v1274_v48 = vadd.f32 %v3293_v40, %v1273_v46  ;;  %v1402_v49 = vadd.f32 %v3354_v16, %v1401_v47 }
 0x2cc   : > { %v1307_v51 = vpack.c.bf16 %v1274_v48, %v1272_v44  ;;  %1934 = vst [vmem:[%s3300_s13 + $0xb8] sm:$0xff] %v1274_v48  ;;  %v1474_v52 = vmax.f32 %v1402_v49, 0.0  ;;  %v2487_v44 = vld [vmem:[#allocation13] sm:$0xff] }
 0x2cd   : > { %1797 = vmatpush.bf16.msrb.mxu1 %v2487_v44 }
 0x2ce   : > { %1443 = vmatmul.bf16.gmra.mxu3 %v1307_v51  ;;  %v1503_v53 = vpack.c.bf16 %v1474_v52, %v1473_v50 }
 0x2d0   : > { %1603 = vmatmul.bf16.gmra.mxu0 %v1503_v53 }
 0x2d1   : > { %v1276_v55 = vpop.f32.mrf.mxu2  ;;  %v1404_v56 = vpop.f32.mrf.mxu3 }
 0x2d2   : > { %v1277_v57 = vadd.f32 %v3293_v40, %v1276_v55  ;;  %v1405_v58 = vadd.f32 %v3354_v16, %v1404_v56 }
 0x2d4   : > { %1935 = vst [vmem:[%s3300_s13 + $0xc0] sm:$0xff] %v1277_v57  ;;  %v1475_v63 = vmax.f32 %v1405_v58, 0.0 }
 0x2d9   : > { %v1278_v59 = vpop.f32.mrf.mxu2  ;;  %v1406_v60 = vpop.f32.mrf.mxu3 }
 0x2da   : > { %v1279_v61 = vadd.f32 %v3293_v40, %v1278_v59  ;;  %v1407_v62 = vadd.f32 %v3354_v16, %v1406_v60  ;;  %v3403_v59 = vld [vmem:[%s3593_s10] ss:$0 sm:$0xff] }
 0x2dc   : > { %v1308_v0 = vpack.c.bf16 %v1279_v61, %v1277_v57  ;;  %1936 = vst [vmem:[%s3300_s13 + $0xc8] sm:$0xff] %v1279_v61  ;;  %v1476_v2 = vmax.f32 %v1407_v62, 0.0 }
 0x2de   : > { %1448 = vmatmul.bf16.gmra.mxu3 %v1308_v0  ;;  %v1504_v30 = vpack.c.bf16 %v1476_v2, %v1475_v63 }
 0x2e0   : > { %1608 = vmatmul.bf16.gmra.mxu0 %v1504_v30 }
 0x2e1   : > { %v1281_v4 = vpop.f32.mrf.mxu2  ;;  %v1409_v1 = vpop.f32.mrf.mxu3 }
 0x2e2   : > { %v1282_v5 = vadd.f32 %v3293_v40, %v1281_v4  ;;  %v1410_v6 = vadd.f32 %v3354_v16, %v1409_v1 }
 0x2e4   : > { %1937 = vst [vmem:[%s3300_s13 + $0xd0] sm:$0xff] %v1282_v5  ;;  %v1477_v11 = vmax.f32 %v1410_v6, 0.0 }
 0x2e9   : > { %v1283_v7 = vpop.f32.mrf.mxu2  ;;  %v1411_v8 = vpop.f32.mrf.mxu3 }
 0x2ea   : > { %v1284_v9 = vadd.f32 %v3293_v40, %v1283_v7  ;;  %v1412_v10 = vadd.f32 %v3354_v16, %v1411_v8 }
 0x2ec   : > { %v1309_v12 = vpack.c.bf16 %v1284_v9, %v1282_v5  ;;  %1938 = vst [vmem:[%s3300_s13 + $0xd8] sm:$0xff] %v1284_v9  ;;  %v1478_v13 = vmax.f32 %v1412_v10, 0.0 }
 0x2ee   : > { %v1505_v14 = vpack.c.bf16 %v1478_v13, %v1477_v11  ;;  %1453 = vmatmul.bf16.gmra.mxu3 %v1309_v12 }
 0x2f0   : > { %1613 = vmatmul.bf16.gmra.mxu0 %v1505_v14 }
 0x2f1   : > { %v1286_v17 = vpop.f32.mrf.mxu2  ;;  %v1414_v18 = vpop.f32.mrf.mxu3 }
 0x2f2   : > { %v1287_v19 = vadd.f32 %v3293_v40, %v1286_v17  ;;  %v1415_v20 = vadd.f32 %v3354_v16, %v1414_v18 }
 0x2f4   : > { %1939 = vst [vmem:[%s3300_s13 + $0xe0] sm:$0xff] %v1287_v19  ;;  %v1479_v25 = vmax.f32 %v1415_v20, 0.0 }
 0x2f9   : > { %v1288_v21 = vpop.f32.mrf.mxu2  ;;  %v1416_v22 = vpop.f32.mrf.mxu3 }
 0x2fa   : > { %v1289_v23 = vadd.f32 %v3293_v40, %v1288_v21  ;;  %v1417_v24 = vadd.f32 %v3354_v16, %v1416_v22 }
 0x2fc   : > { %v1310_v26 = vpack.c.bf16 %v1289_v23, %v1287_v19  ;;  %1940 = vst [vmem:[%s3300_s13 + $0xe8] sm:$0xff] %v1289_v23  ;;  %v1480_v27 = vmax.f32 %v1417_v24, 0.0 }
 0x2fe   : > { %v1506_v28 = vpack.c.bf16 %v1480_v27, %v1479_v25  ;;  %1458 = vmatmul.bf16.gmra.mxu3 %v1310_v26 }
 0x300   : > { %1618 = vmatmul.bf16.gmra.mxu0 %v1506_v28 }
 0x301   : > { %v1291_v31 = vpop.f32.mrf.mxu2  ;;  %v1419_v32 = vpop.f32.mrf.mxu3 }
 0x302   : > { %v1292_v33 = vadd.f32 %v3293_v40, %v1291_v31  ;;  %v1420_v34 = vadd.f32 %v3354_v16, %v1419_v32 }
 0x304   : > { %1941 = vst [vmem:[%s3300_s13 + $0xf0] sm:$0xff] %v1292_v33  ;;  %v1481_v39 = vmax.f32 %v1420_v34, 0.0 }
 0x309   : > { %v1293_v35 = vpop.f32.mrf.mxu2  ;;  %v1421_v36 = vpop.f32.mrf.mxu3 }
 0x30a   : > { %v1294_v37 = vadd.f32 %v3293_v40, %v1293_v35  ;;  %v1422_v38 = vadd.f32 %v3354_v16, %v1421_v36 }
 0x30c   : > { %v1311_v41 = vpack.c.bf16 %v1294_v37, %v1292_v33  ;;  %1942 = vst [vmem:[%s3300_s13 + $0xf8] sm:$0xff] %v1294_v37  ;;  %v1482_v42 = vmax.f32 %v1422_v38, 0.0 }
 0x30e   : > { %v1507_v43 = vpack.c.bf16 %v1482_v42, %v1481_v39  ;;  %1463 = vmatmul.bf16.gmra.mxu3 %v1311_v41 }
 0x310   : > { %1623 = vmatmul.bf16.gmra.mxu0 %v1507_v43 }
 0x311   : > { %v1424_v45 = vpop.f32.mrf.mxu3 }
 0x312   : > { %v1425_v46 = vadd.f32 %v3354_v16, %v1424_v45 }
 0x314   : > { %v1483_v49 = vmax.f32 %v1425_v46, 0.0 }
 0x319   : > { %v1426_v47 = vpop.f32.mrf.mxu3 }
 0x31a   : > { %v1427_v48 = vadd.f32 %v3354_v16, %v1426_v47 }
 0x31c   : > { %v1484_v50 = vmax.f32 %v1427_v48, 0.0 }
 0x31e   : > { %v1508_v40 = vpack.c.bf16 %v1484_v50, %v1483_v49 }
 0x320   : > { %1628 = vmatmul.bf16.gmra.mxu0 %v1508_v40 }
 0x321   : > { %v1429_v51 = vpop.f32.mrf.mxu3 }
 0x322   : > { %v1430_v52 = vadd.f32 %v3354_v16, %v1429_v51 }
 0x324   : > { %v1485_v55 = vmax.f32 %v1430_v52, 0.0 }
 0x329   : > { %v1431_v53 = vpop.f32.mrf.mxu3 }
 0x32a   : > { %v1432_v54 = vadd.f32 %v3354_v16, %v1431_v53 }
 0x32c   : > { %v1486_v56 = vmax.f32 %v1432_v54, 0.0 }
 0x32d   : > { %v1594_v57 = vpop.f32.mrf.mxu0 }
 0x32e   : > { %v1509_v58 = vpack.c.bf16 %v1486_v56, %v1485_v55  ;;  %v1595_v61 = vadd.f32 %v3403_v59, %v1594_v57 }
 0x330   : > { %1633 = vmatmul.bf16.gmra.mxu0 %v1509_v58  ;;  %v1674_v0 = vmax.f32 %v1595_v61, 0.0 }
 0x331   : > { %v1434_v60 = vpop.f32.mrf.mxu3 }
 0x332   : > { %v1435_v2 = vadd.f32 %v3354_v16, %v1434_v60 }
 0x334   : > { %v1487_v5 = vmax.f32 %v1435_v2, 0.0 }
 0x335   : > { %v1596_v62 = vpop.f32.mrf.mxu0 }
 0x336   : > { %v1597_v63 = vadd.f32 %v3403_v59, %v1596_v62 }
 0x338   : > { %v1675_v30 = vmax.f32 %v1597_v63, 0.0 }
 0x339   : > { %v1436_v3 = vpop.f32.mrf.mxu3 }
 0x33a   : > { %v1437_v4 = vadd.f32 %v3354_v16, %v1436_v3  ;;  %v1706_v1 = vpack.c.bf16 %v1675_v30, %v1674_v0 }
 0x33c   : > { %v1488_v6 = vmax.f32 %v1437_v4, 0.0  ;;  %1798 = vmatmul.bf16.vlgmr.msrb.gmra.mxu1 %v1706_v1 }
 0x33d   : > { %v1599_v7 = vpop.f32.mrf.mxu0 }
 0x33e   : > { %v1510_v8 = vpack.c.bf16 %v1488_v6, %v1487_v5  ;;  %v1600_v10 = vadd.f32 %v3403_v59, %v1599_v7 }
 0x340   : > { %1638 = vmatmul.bf16.gmra.mxu0 %v1510_v8  ;;  %v1676_v13 = vmax.f32 %v1600_v10, 0.0 }
 0x341   : > { %v1439_v9 = vpop.f32.mrf.mxu3 }
 0x342   : > { %v1440_v14 = vadd.f32 %v3354_v16, %v1439_v9 }
 0x344   : > { %v1489_v20 = vmax.f32 %v1440_v14, 0.0 }
 0x345   : > { %v1601_v11 = vpop.f32.mrf.mxu0 }
 0x346   : > { %v1602_v12 = vadd.f32 %v3403_v59, %v1601_v11 }
 0x348   : > { %v1677_v15 = vmax.f32 %v1602_v12, 0.0 }
 0x349   : > { %v1441_v17 = vpop.f32.mrf.mxu3 }
 0x34a   : > { %v1442_v18 = vadd.f32 %v3354_v16, %v1441_v17  ;;  %v1707_v19 = vpack.c.bf16 %v1677_v15, %v1676_v13 }
 0x34c   : > { %v1490_v21 = vmax.f32 %v1442_v18, 0.0  ;;  %1803 = vmatmul.bf16.gmra.mxu1 %v1707_v19 }
 0x34d   : > { %v1604_v22 = vpop.f32.mrf.mxu0 }
 0x34e   : > { %v1511_v23 = vpack.c.bf16 %v1490_v21, %v1489_v20  ;;  %v1605_v25 = vadd.f32 %v3403_v59, %v1604_v22 }
 0x350   : > { %1643 = vmatmul.bf16.gmra.mxu0 %v1511_v23  ;;  %v1678_v28 = vmax.f32 %v1605_v25, 0.0 }
 0x351   : > { %v1444_v24 = vpop.f32.mrf.mxu3 }
 0x352   : > { %v1445_v29 = vadd.f32 %v3354_v16, %v1444_v24 }
 0x354   : > { %v1491_v35 = vmax.f32 %v1445_v29, 0.0 }
 0x355   : > { %v1606_v26 = vpop.f32.mrf.mxu0 }
 0x356   : > { %v1607_v27 = vadd.f32 %v3403_v59, %v1606_v26 }
 0x358   : > { %v1679_v31 = vmax.f32 %v1607_v27, 0.0 }
 0x359   : > { %v1446_v32 = vpop.f32.mrf.mxu3 }
 0x35a   : > { %v1447_v33 = vadd.f32 %v3354_v16, %v1446_v32  ;;  %v1708_v34 = vpack.c.bf16 %v1679_v31, %v1678_v28 }
 0x35c   : > { %v1492_v36 = vmax.f32 %v1447_v33, 0.0  ;;  %1808 = vmatmul.bf16.gmra.mxu1 %v1708_v34 }
 0x35d   : > { %v1609_v37 = vpop.f32.mrf.mxu0 }
 0x35e   : > { %v1512_v38 = vpack.c.bf16 %v1492_v36, %v1491_v35  ;;  %v1610_v41 = vadd.f32 %v3403_v59, %v1609_v37 }
 0x360   : > { %1648 = vmatmul.bf16.gmra.mxu0 %v1512_v38  ;;  %v1680_v44 = vmax.f32 %v1610_v41, 0.0 }
 0x361   : > { %v1449_v39 = vpop.f32.mrf.mxu3 }
 0x362   : > { %v1450_v45 = vadd.f32 %v3354_v16, %v1449_v39 }
 0x364   : > { %v1493_v50 = vmax.f32 %v1450_v45, 0.0 }
 0x365   : > { %v1611_v42 = vpop.f32.mrf.mxu0 }
 0x366   : > { %v1612_v43 = vadd.f32 %v3403_v59, %v1611_v42 }
 0x368   : > { %v1681_v46 = vmax.f32 %v1612_v43, 0.0  ;;  %v3440_v43 = vld [vmem:[%s3595_s12] ss:$0 sm:$0xff] }
 0x369   : > { %v1451_v47 = vpop.f32.mrf.mxu3 }
 0x36a   : > { %v1452_v48 = vadd.f32 %v3354_v16, %v1451_v47  ;;  %v1709_v49 = vpack.c.bf16 %v1681_v46, %v1680_v44 }
 0x36c   : > { %v1494_v40 = vmax.f32 %v1452_v48, 0.0  ;;  %1813 = vmatmul.bf16.gmra.mxu1 %v1709_v49 }
 0x36d   : > { %v1614_v51 = vpop.f32.mrf.mxu0 }
 0x36e   : > { %v1513_v52 = vpack.c.bf16 %v1494_v40, %v1493_v50  ;;  %v1615_v54 = vadd.f32 %v3403_v59, %v1614_v51 }
 0x370   : > { %1653 = vmatmul.bf16.gmra.mxu0 %v1513_v52  ;;  %v1682_v57 = vmax.f32 %v1615_v54, 0.0 }
 0x371   : > { %v1454_v53 = vpop.f32.mrf.mxu3 }
 0x372   : > { %v1455_v58 = vadd.f32 %v3354_v16, %v1454_v53 }
 0x374   : > { %v1495_v0 = vmax.f32 %v1455_v58, 0.0 }
 0x375   : > { %v1616_v55 = vpop.f32.mrf.mxu0 }
 0x376   : > { %v1617_v56 = vadd.f32 %v3403_v59, %v1616_v55 }
 0x378   : > { %v1683_v60 = vmax.f32 %v1617_v56, 0.0 }
 0x379   : > { %v1456_v61 = vpop.f32.mrf.mxu3 }
 0x37a   : > { %v1710_v62 = vpack.c.bf16 %v1683_v60, %v1682_v57  ;;  %v1457_v63 = vadd.f32 %v3354_v16, %v1456_v61 }
 0x37c   : > { %v1496_v2 = vmax.f32 %v1457_v63, 0.0  ;;  %1818 = vmatmul.bf16.gmra.mxu1 %v1710_v62 }
 0x37d   : > { %v1619_v30 = vpop.f32.mrf.mxu0 }
 0x37e   : > { %v1514_v3 = vpack.c.bf16 %v1496_v2, %v1495_v0  ;;  %v1620_v1 = vadd.f32 %v3403_v59, %v1619_v30 }
 0x380   : > { %1658 = vmatmul.bf16.gmra.mxu0 %v1514_v3  ;;  %v1684_v7 = vmax.f32 %v1620_v1, 0.0 }
 0x381   : > { %v1459_v4 = vpop.f32.mrf.mxu3 }
 0x382   : > { %v1460_v8 = vadd.f32 %v3354_v16, %v1459_v4 }
 0x384   : > { %v1497_v13 = vmax.f32 %v1460_v8, 0.0 }
 0x385   : > { %v1621_v5 = vpop.f32.mrf.mxu0 }
 0x386   : > { %v1622_v6 = vadd.f32 %v3403_v59, %v1621_v5 }
 0x388   : > { %v1685_v9 = vmax.f32 %v1622_v6, 0.0 }
 0x389   : > { %v1461_v10 = vpop.f32.mrf.mxu3 }
 0x38a   : > { %v1711_v11 = vpack.c.bf16 %v1685_v9, %v1684_v7  ;;  %v1462_v12 = vadd.f32 %v3354_v16, %v1461_v10 }
 0x38c   : > { %v1498_v14 = vmax.f32 %v1462_v12, 0.0  ;;  %1823 = vmatmul.bf16.gmra.mxu1 %v1711_v11 }
 0x38d   : > { %v1624_v15 = vpop.f32.mrf.mxu0 }
 0x38e   : > { %v1515_v17 = vpack.c.bf16 %v1498_v14, %v1497_v13  ;;  %v1625_v19 = vadd.f32 %v3403_v59, %v1624_v15 }
 0x390   : > { %1663 = vmatmul.bf16.gmra.mxu0 %v1515_v17  ;;  %v1686_v22 = vmax.f32 %v1625_v19, 0.0 }
 0x391   : > { %v1464_v18 = vpop.f32.mrf.mxu3 }
 0x392   : > { %v1465_v23 = vadd.f32 %v3354_v16, %v1464_v18 }
 0x394   : > { %v1499_v28 = vmax.f32 %v1465_v23, 0.0 }
 0x395   : > { %v1626_v20 = vpop.f32.mrf.mxu0 }
 0x396   : > { %v1627_v21 = vadd.f32 %v3403_v59, %v1626_v20 }
 0x398   : > { %v1687_v24 = vmax.f32 %v1627_v21, 0.0 }
 0x399   : > { %v1466_v25 = vpop.f32.mrf.mxu3 }
 0x39a   : > { %v1712_v26 = vpack.c.bf16 %v1687_v24, %v1686_v22  ;;  %v1467_v27 = vadd.f32 %v3354_v16, %v1466_v25 }
 0x39c   : > { %v1500_v29 = vmax.f32 %v1467_v27, 0.0  ;;  %1828 = vmatmul.bf16.gmra.mxu1 %v1712_v26 }
 0x39d   : > { %v1629_v31 = vpop.f32.mrf.mxu0 }
 0x39e   : > { %v1516_v32 = vpack.c.bf16 %v1500_v29, %v1499_v28  ;;  %v1630_v33 = vadd.f32 %v3403_v59, %v1629_v31 }
 0x3a0   : > { %1668 = vmatmul.bf16.gmra.mxu0 %v1516_v32  ;;  %v1688_v36 = vmax.f32 %v1630_v33, 0.0 }
 0x3a5   : > { %v1631_v34 = vpop.f32.mrf.mxu0 }
 0x3a6   : > { %v1632_v35 = vadd.f32 %v3403_v59, %v1631_v34 }
 0x3a8   : > { %v1689_v37 = vmax.f32 %v1632_v35, 0.0 }
 0x3aa   : > { %v1713_v38 = vpack.c.bf16 %v1689_v37, %v1688_v36 }
 0x3ac   : > { %1833 = vmatmul.bf16.gmra.mxu1 %v1713_v38 }
 0x3ad   : > { %v1634_v39 = vpop.f32.mrf.mxu0 }
 0x3ae   : > { %v1635_v41 = vadd.f32 %v3403_v59, %v1634_v39 }
 0x3b0   : > { %v1690_v44 = vmax.f32 %v1635_v41, 0.0 }
 0x3b5   : > { %v1636_v16 = vpop.f32.mrf.mxu0 }
 0x3b6   : > { %v1637_v42 = vadd.f32 %v3403_v59, %v1636_v16 }
 0x3b8   : > { %v1691_v45 = vmax.f32 %v1637_v42, 0.0 }
 0x3b9   : > { %v1799_v46 = vpop.f32.mrf.mxu1 }
 0x3ba   : > { %v1714_v47 = vpack.c.bf16 %v1691_v45, %v1690_v44  ;;  %v1800_v48 = vadd.f32 %v3440_v43, %v1799_v46 }
 0x3bc   : > { %1879 = vst [vmem:[%s3445_s28] sm:$0xff] %v1800_v48  ;;  %1838 = vmatmul.bf16.gmra.mxu1 %v1714_v47 }
 0x3bd   : > { %v1639_v49 = vpop.f32.mrf.mxu0 }
 0x3be   : > { %v1640_v51 = vadd.f32 %v3403_v59, %v1639_v49 }
 0x3c0   : > { %v1692_v54 = vmax.f32 %v1640_v51, 0.0 }
 0x3c1   : > { %v1801_v50 = vpop.f32.mrf.mxu1 }
 0x3c2   : > { %v1802_v40 = vadd.f32 %v3440_v43, %v1801_v50 }
 0x3c4   : > { %1880 = vst [vmem:[%s3445_s28 + $0x8] sm:$0xff] %v1802_v40 }
 0x3c5   : > { %v1641_v52 = vpop.f32.mrf.mxu0 }
 0x3c6   : > { %v1642_v53 = vadd.f32 %v3403_v59, %v1641_v52 }
 0x3c8   : > { %v1693_v55 = vmax.f32 %v1642_v53, 0.0 }
 0x3c9   : > { %v1804_v56 = vpop.f32.mrf.mxu1 }
 0x3ca   : > { %v1715_v57 = vpack.c.bf16 %v1693_v55, %v1692_v54  ;;  %v1805_v58 = vadd.f32 %v3440_v43, %v1804_v56 }
 0x3cc   : > { %1881 = vst [vmem:[%s3445_s28 + $0x10] sm:$0xff] %v1805_v58  ;;  %1843 = vmatmul.bf16.gmra.mxu1 %v1715_v57 }
 0x3cd   : > { %v1644_v60 = vpop.f32.mrf.mxu0 }
 0x3ce   : > { %v1645_v63 = vadd.f32 %v3403_v59, %v1644_v60 }
 0x3d0   : > { %v1694_v30 = vmax.f32 %v1645_v63, 0.0 }
 0x3d1   : > { %v1806_v61 = vpop.f32.mrf.mxu1 }
 0x3d2   : > { %v1807_v62 = vadd.f32 %v3440_v43, %v1806_v61 }
 0x3d4   : > { %1882 = vst [vmem:[%s3445_s28 + $0x18] sm:$0xff] %v1807_v62 }
 0x3d5   : > { %v1646_v0 = vpop.f32.mrf.mxu0 }
 0x3d6   : > { %v1647_v2 = vadd.f32 %v3403_v59, %v1646_v0 }
 0x3d8   : > { %v1695_v3 = vmax.f32 %v1647_v2, 0.0 }
 0x3d9   : > { %v1809_v4 = vpop.f32.mrf.mxu1 }
 0x3da   : > { %v1716_v1 = vpack.c.bf16 %v1695_v3, %v1694_v30  ;;  %v1810_v5 = vadd.f32 %v3440_v43, %v1809_v4 }
 0x3dc   : > { %1883 = vst [vmem:[%s3445_s28 + $0x20] sm:$0xff] %v1810_v5  ;;  %1848 = vmatmul.bf16.gmra.mxu1 %v1716_v1 }
 0x3dd   : > { %v1649_v6 = vpop.f32.mrf.mxu0 }
 0x3de   : > { %v1650_v9 = vadd.f32 %v3403_v59, %v1649_v6 }
 0x3e0   : > { %v1696_v12 = vmax.f32 %v1650_v9, 0.0 }
 0x3e1   : > { %v1811_v7 = vpop.f32.mrf.mxu1 }
 0x3e2   : > { %v1812_v8 = vadd.f32 %v3440_v43, %v1811_v7 }
 0x3e4   : > { %1884 = vst [vmem:[%s3445_s28 + $0x28] sm:$0xff] %v1812_v8 }
 0x3e5   : > { %v1651_v10 = vpop.f32.mrf.mxu0 }
 0x3e6   : > { %v1652_v11 = vadd.f32 %v3403_v59, %v1651_v10 }
 0x3e8   : > { %v1697_v13 = vmax.f32 %v1652_v11, 0.0 }
 0x3e9   : > { %v1814_v14 = vpop.f32.mrf.mxu1 }
 0x3ea   : > { %v1717_v15 = vpack.c.bf16 %v1697_v13, %v1696_v12  ;;  %v1815_v17 = vadd.f32 %v3440_v43, %v1814_v14 }
 0x3ec   : > { %1885 = vst [vmem:[%s3445_s28 + $0x30] sm:$0xff] %v1815_v17  ;;  %1853 = vmatmul.bf16.gmra.mxu1 %v1717_v15 }
 0x3ed   : > { %v1654_v18 = vpop.f32.mrf.mxu0 }
 0x3ee   : > { %v1655_v21 = vadd.f32 %v3403_v59, %v1654_v18 }
 0x3f0   : > { %v1698_v24 = vmax.f32 %v1655_v21, 0.0 }
 0x3f1   : > { %v1816_v19 = vpop.f32.mrf.mxu1 }
 0x3f2   : > { %v1817_v20 = vadd.f32 %v3440_v43, %v1816_v19 }
 0x3f4   : > { %1886 = vst [vmem:[%s3445_s28 + $0x38] sm:$0xff] %v1817_v20 }
 0x3f5   : > { %v1656_v22 = vpop.f32.mrf.mxu0 }
 0x3f6   : > { %v1657_v23 = vadd.f32 %v3403_v59, %v1656_v22 }
 0x3f8   : > { %v1699_v25 = vmax.f32 %v1657_v23, 0.0 }
 0x3f9   : > { %v1819_v26 = vpop.f32.mrf.mxu1 }
 0x3fa   : > { %v1718_v27 = vpack.c.bf16 %v1699_v25, %v1698_v24  ;;  %v1820_v28 = vadd.f32 %v3440_v43, %v1819_v26 }
 0x3fc   : > { %1887 = vst [vmem:[%s3445_s28 + $0x40] sm:$0xff] %v1820_v28  ;;  %1858 = vmatmul.bf16.gmra.mxu1 %v1718_v27 }
 0x3fd   : > { %v1659_v29 = vpop.f32.mrf.mxu0 }
 0x3fe   : > { %v1660_v33 = vadd.f32 %v3403_v59, %v1659_v29 }
 0x400   : > { %v1700_v36 = vmax.f32 %v1660_v33, 0.0 }
 0x401   : > { %v1821_v31 = vpop.f32.mrf.mxu1 }
 0x402   : > { %v1822_v32 = vadd.f32 %v3440_v43, %v1821_v31 }
 0x404   : > { %1888 = vst [vmem:[%s3445_s28 + $0x48] sm:$0xff] %v1822_v32 }
 0x405   : > { %v1661_v34 = vpop.f32.mrf.mxu0 }
 0x406   : > { %v1662_v35 = vadd.f32 %v3403_v59, %v1661_v34 }
 0x408   : > { %v1701_v37 = vmax.f32 %v1662_v35, 0.0 }
 0x409   : > { %v1824_v38 = vpop.f32.mrf.mxu1 }
 0x40a   : > { %v1719_v39 = vpack.c.bf16 %v1701_v37, %v1700_v36  ;;  %v1825_v41 = vadd.f32 %v3440_v43, %v1824_v38 }
 0x40c   : > { %1889 = vst [vmem:[%s3445_s28 + $0x50] sm:$0xff] %v1825_v41  ;;  %1863 = vmatmul.bf16.gmra.mxu1 %v1719_v39 }
 0x40d   : > { %v1664_v16 = vpop.f32.mrf.mxu0 }
 0x40e   : > { %v1665_v45 = vadd.f32 %v3403_v59, %v1664_v16 }
 0x410   : > { %v1702_v48 = vmax.f32 %v1665_v45, 0.0 }
 0x411   : > { %v1826_v42 = vpop.f32.mrf.mxu1 }
 0x412   : > { %v1827_v44 = vadd.f32 %v3440_v43, %v1826_v42 }
 0x414   : > { %1890 = vst [vmem:[%s3445_s28 + $0x58] sm:$0xff] %v1827_v44 }
 0x415   : > { %v1666_v46 = vpop.f32.mrf.mxu0 }
 0x416   : > { %v1667_v47 = vadd.f32 %v3403_v59, %v1666_v46 }
 0x418   : > { %v1703_v49 = vmax.f32 %v1667_v47, 0.0 }
 0x419   : > { %v1829_v50 = vpop.f32.mrf.mxu1 }
 0x41a   : > { %v1720_v40 = vpack.c.bf16 %v1703_v49, %v1702_v48  ;;  %v1830_v51 = vadd.f32 %v3440_v43, %v1829_v50 }
 0x41c   : > { %1891 = vst [vmem:[%s3445_s28 + $0x60] sm:$0xff] %v1830_v51  ;;  %1868 = vmatmul.bf16.gmra.mxu1 %v1720_v40 }
 0x41d   : > { %v1669_v52 = vpop.f32.mrf.mxu0 }
 0x41e   : > { %v1670_v55 = vadd.f32 %v3403_v59, %v1669_v52 }
 0x420   : > { %v1704_v58 = vmax.f32 %v1670_v55, 0.0 }
 0x421   : > { %v1831_v53 = vpop.f32.mrf.mxu1 }
 0x422   : > { %v1832_v54 = vadd.f32 %v3440_v43, %v1831_v53 }
 0x424   : > { %1892 = vst [vmem:[%s3445_s28 + $0x68] sm:$0xff] %v1832_v54 }
 0x425   : > { %v1671_v56 = vpop.f32.mrf.mxu0 }
 0x426   : > { %v1672_v57 = vadd.f32 %v3403_v59, %v1671_v56 }
 0x428   : > { %v1705_v60 = vmax.f32 %v1672_v57, 0.0 }
 0x429   : > { %v1834_v61 = vpop.f32.mrf.mxu1 }
 0x42a   : > { %v1721_v62 = vpack.c.bf16 %v1705_v60, %v1704_v58  ;;  %v1835_v63 = vadd.f32 %v3440_v43, %v1834_v61 }
 0x42c   : > { %1893 = vst [vmem:[%s3445_s28 + $0x70] sm:$0xff] %v1835_v63  ;;  %1873 = vmatmul.bf16.gmra.mxu1 %v1721_v62 }
 0x431   : > { %v1836_v0 = vpop.f32.mrf.mxu1 }
 0x432   : > { %v1837_v2 = vadd.f32 %v3440_v43, %v1836_v0 }
 0x434   : > { %1894 = vst [vmem:[%s3445_s28 + $0x78] sm:$0xff] %v1837_v2 }
 0x439   : > { %v1839_v59 = vpop.f32.mrf.mxu1 }
 0x43a   : > { %2872 = shalt.err (!%p2869_p9)
}
 0x43b   : > { %s2965_s13 = smov 128   ;;  %s2966_s9 = smov 8   ;;  %v1840_v30 = vadd.f32 %v3440_v43, %v1839_v59 }
 0x43c   : > { %2540 = dma.vmem_to_hbm [thread:$0]  (%p3157_p4), %s1979_s19, 4096, %s1981_s14, %s1949_s22, %s2965_s13, %s2965_s13, %s2966_s9  }
 0x43d   : > { %1895 = vst [vmem:[%s3445_s28 + $0x80] sm:$0xff] %v1840_v30  ;;  %s3629_s19 = sld [smem:[#allocation31_spill]]  ;;  %s1961_s22 = sshll.u32 %s3445_s28, 4  ;;  %s1962_s22 = int_to_ptr.vmem [resolvable:$true] %s1961_s22 }
 0x43e   : > { %s1944_s25 = scalar_lea.sflag [#allocation4], %s3191_s24 }
 0x441   : > { %v1841_v3 = vpop.f32.mrf.mxu1 }
 0x442   : > { %v1842_v4 = vadd.f32 %v3440_v43, %v1841_v3 }
 0x443   : > { %s1960_s14 = scalar_lea.hbm %s3629_s19, %s2495_s3  ;;  %s2893_s3 = scalar_lea.hbm %s3629_s19, 512 }
 0x444   : > { %1896 = vst [vmem:[%s3445_s28 + $0x88] sm:$0xff] %v1842_v4  ;;  %s1963_s27 = sshll.u32 %s1960_s14, 4  ;;  %s1964_s27 = int_to_ptr.hbm [resolvable:$true] %s1963_s27 }
 0x445   : > { %s2887_s1 = sshra.s32 %s1964_s27, 4  ;;  %s2888_s1 = int_to_ptr.hbm [resolvable:$true] %s2887_s1 }
 0x446   : > { %s2889_s11 = scalar_lea.hbm %s2888_s1, 256  ;;  %p2894_p0 = scmp.lt.s32.totalorder %s2888_s1, %s3629_s19 }
 0x447   : > { %p2890_p10 = scmp.ne.s32.totalorder %s2888_s1, %s2889_s11  ;;  %p2895_p2 = scmp.lt.s32.totalorder %s2893_s3, %s2889_s11 }
 0x449   : > { %v1844_v1 = vpop.f32.mrf.mxu1  ;;  %p2891_p13 = pnand %p2890_p10, %p3157_p4  ;;  %p2896_p1 = por %p2895_p2, %p2894_p0 }
 0x44a   : > { %v1845_v5 = vadd.f32 %v3440_v43, %v1844_v1 }
 0x44b   : > { %p2892_p11 = pneg %p2891_p13 }
 0x44c   : > { %1897 = vst [vmem:[%s3445_s28 + $0x90] sm:$0xff] %v1845_v5 }
 0x44d   : > { %p2897_p3 = pnand %p2896_p1, %p2892_p11 }
 0x451   : > { %v1846_v6 = vpop.f32.mrf.mxu1 }
 0x452   : > { %v1847_v7 = vadd.f32 %v3440_v43, %v1846_v6 }
 0x454   : > { %1898 = vst [vmem:[%s3445_s28 + $0x98] sm:$0xff] %v1847_v7 }
 0x459   : > { %v1849_v8 = vpop.f32.mrf.mxu1 }
 0x45a   : > { %v1850_v9 = vadd.f32 %v3440_v43, %v1849_v8 }
 0x45c   : > { %1899 = vst [vmem:[%s3445_s28 + $0xa0] sm:$0xff] %v1850_v9 }
 0x461   : > { %v1851_v10 = vpop.f32.mrf.mxu1 }
 0x462   : > { %v1852_v11 = vadd.f32 %v3440_v43, %v1851_v10 }
 0x464   : > { %1900 = vst [vmem:[%s3445_s28 + $0xa8] sm:$0xff] %v1852_v11 }
 0x469   : > { %v1854_v12 = vpop.f32.mrf.mxu1 }
 0x46a   : > { %v1855_v13 = vadd.f32 %v3440_v43, %v1854_v12 }
 0x46c   : > { %1901 = vst [vmem:[%s3445_s28 + $0xb0] sm:$0xff] %v1855_v13 }
 0x471   : > { %v1856_v14 = vpop.f32.mrf.mxu1 }
 0x472   : > { %v1857_v15 = vadd.f32 %v3440_v43, %v1856_v14 }
 0x474   : > { %1902 = vst [vmem:[%s3445_s28 + $0xb8] sm:$0xff] %v1857_v15 }
 0x479   : > { %v1859_v17 = vpop.f32.mrf.mxu1 }
 0x47a   : > { %v1860_v18 = vadd.f32 %v3440_v43, %v1859_v17 }
 0x47c   : > { %1903 = vst [vmem:[%s3445_s28 + $0xc0] sm:$0xff] %v1860_v18 }
 0x481   : > { %v1861_v19 = vpop.f32.mrf.mxu1 }
 0x482   : > { %v1862_v20 = vadd.f32 %v3440_v43, %v1861_v19 }
 0x484   : > { %1904 = vst [vmem:[%s3445_s28 + $0xc8] sm:$0xff] %v1862_v20 }
 0x489   : > { %v1864_v21 = vpop.f32.mrf.mxu1 }
 0x48a   : > { %v1865_v22 = vadd.f32 %v3440_v43, %v1864_v21 }
 0x48c   : > { %1905 = vst [vmem:[%s3445_s28 + $0xd0] sm:$0xff] %v1865_v22 }
 0x491   : > { %v1866_v23 = vpop.f32.mrf.mxu1 }
 0x492   : > { %v1867_v24 = vadd.f32 %v3440_v43, %v1866_v23 }
 0x494   : > { %1906 = vst [vmem:[%s3445_s28 + $0xd8] sm:$0xff] %v1867_v24 }
 0x499   : > { %v1869_v25 = vpop.f32.mrf.mxu1 }
 0x49a   : > { %v1870_v26 = vadd.f32 %v3440_v43, %v1869_v25 }
 0x49c   : > { %1907 = vst [vmem:[%s3445_s28 + $0xe0] sm:$0xff] %v1870_v26 }
 0x4a1   : > { %v1871_v27 = vpop.f32.mrf.mxu1 }
 0x4a2   : > { %v1872_v28 = vadd.f32 %v3440_v43, %v1871_v27 }
 0x4a4   : > { %1908 = vst [vmem:[%s3445_s28 + $0xe8] sm:$0xff] %v1872_v28 }
 0x4a9   : > { %v1874_v29 = vpop.f32.mrf.mxu1 }
 0x4aa   : > { %v1875_v31 = vadd.f32 %v3440_v43, %v1874_v29 }
 0x4ac   : > { %1909 = vst [vmem:[%s3445_s28 + $0xf0] sm:$0xff] %v1875_v31 }
 0x4b1   : > { %v1876_v32 = vpop.f32.mrf.mxu1 }
 0x4b2   : > { %v1877_v33 = vadd.f32 %v3440_v43, %v1876_v32 }
 0x4b4   : > { %1910 = vst [vmem:[%s3445_s28 + $0xf8] sm:$0xff] %v1877_v33 }
 0x4b5   : > { %2900 = shalt.err (!%p2897_p3)
}
 0x4b6   : > { %2539 = dma.vmem_to_hbm [thread:$0]  (%p3157_p4), %s1962_s22, 4096, %s1964_s27, %s1944_s25, %s2965_s13, %s2965_s13, %s2966_s9  }
 0x4b7 PF: > { %s1995_s24 = sand.u32 1, %s2943_s29   ;;  %p3630_p5 = scmp.ge.s32.totalorder %s2955_s16, 2 }
 0x4b8   : > { %s1996_s28 = scalar_lea.sflag [#allocation4], %s1995_s24 }
 0x4b9   : > { %p2567_p12 = pnand %p3630_p5, %p3161_p6 }
 0x4bb   : > { %p2568_p7 = pneg %p2567_p12 }
 0x4bd   : > { %2934 = dma.done.wait (%p2568_p7), %s1996_s28, 4096  }
 0x4be   : > { %2936 = vsyncadd (%p2568_p7), %s1996_s28, 4294963200  ;;  %s2006_s18 = scalar_lea.sflag [#allocation16], %s1995_s24 }
 0x4bf   : > { %2938 = dma.done.wait (%p2568_p7), %s2006_s18, 4096  }
 0x4c0   : > { %2940 = vsyncadd (%p2568_p7), %s2006_s18, 4294963200  ;;  %s3631_s17 = sld [smem:[#allocation23_spill]]  ;;  %p34_p4 = scmp.ge.s32.totalorder %s3131_s23, 4  }
 0x4c1   : > { %s3632_s29 = smov %s2947_s30  ;;  %s3633_s30 = smov %s2951_s15 }
 0x4c2   : > { %s3635_s16 = smov %s3131_s23  ;;  %36 = sbr.rel (!%p34_p4) target bundleno = 20 (0x14), region = 158 }
 0x4c6   : > { %s3634_s15 = smov %s3631_s17 }
 0x4c7   :  { %2012 = vsyncpa [#allocation3], 1 }
 0x4c8   :  { %2014 = vsyncpa [#allocation3 + $0x1], 1 }
 0x4c9   :  { %2015 = vsyncpa [#allocation6], 1 }
 0x4ca   :  { %2016 = vsyncpa [#allocation9], 1 }
 0x4cb   :  { %2017 = vsyncpa [#allocation12], 1 }
 0x4cc   :  { %2018 = vsyncpa [#allocation4], 1 }
 0x4cd   :  { %2020 = vsyncpa [#allocation4 + $0x1], 1 }
 0x4ce   :  { %2021 = vsyncpa [#allocation16], 1 }
 0x4cf   :  { %2023 = vsyncpa [#allocation16 + $0x1], 1 }

</bundles_post_ra>
